<compile_context>
chip_gen: v7x
topology: tpu7x:2x2x1
jax: 0.10.0
libtpu: 0.0.40
codegen_flags: <defaults>
</compile_context>

<pallas_src>
import jax
import jax.numpy as jnp
from jax import lax
from jax.experimental import pallas as pl
from jax.experimental.pallas import tpu as pltpu
import numpy as np


def _round_up(x, m):
    return (x + m - 1) // m * m


def _lstm_recurrent_kernel(xw_ref, whh_ref, out_ref, h_ref, c_ref):
    # xw_ref : (Tc, Tb, 4H) precomputed x_t @ W_ih^T + (b_ih + b_hh), streamed
    #          in bf16 (cast to f32 inside the kernel).
    # whh_ref: (H, 4H)      W_hh^T; constant-index block, fetched once and
    #          left resident by the pipeline.
    # out_ref: (Tc, Tb, H)  hidden states for this chunk (stream dtype).
    # h_ref/c_ref: (Tb, H)  f32 carried state; persists across the time grid
    #          axis, re-initialized at time-chunk 0 of each batch tile.
    @pl.when(pl.program_id(1) == 0)
    def _():
        # NOTE: the fori_loop below reads h_ref/c_ref immediately after this
        # init; correct under Pallas ref ordering -- keep init and first read
        # adjacent if this is ever restructured.
        h_ref[...] = jnp.zeros_like(h_ref)
        c_ref[...] = jnp.zeros_like(c_ref)

    H = h_ref.shape[-1]
    tc = xw_ref.shape[0]
    whh = whh_ref[...]

    def step(j, carry):
        h, c = carry
        # Only the small recurrent matmul stays on the serial path; f32
        # accumulation, f32 elementwise (v5e-safe even with bf16 streaming).
        gates = xw_ref[j].astype(jnp.float32) + jnp.dot(
            h, whh, preferred_element_type=jnp.float32)
        # TODO(synk): hold W_hh in the MXU across the chunk via
        # pltpu.matmul_push_rhs / matmul_acc_lhs / matmul_pop to skip the
        # per-step RHS push on the latency-bound chain.
        # Full-vreg activations: 2 EUP passes over (Tb, 4H) instead of 4
        # quarter-lane passes; gate extraction is a static slice afterwards.
        sg = jax.nn.sigmoid(gates)
        tg = jnp.tanh(gates)
        i_g = sg[:, 0 * H:1 * H]
        f_g = sg[:, 1 * H:2 * H]
        g_g = tg[:, 2 * H:3 * H]
        o_g = sg[:, 3 * H:4 * H]
        c_new = f_g * c + i_g * g_g
        h_new = o_g * jnp.tanh(c_new)
        # At H >= 128 this store is lane-dense; for small H a lane-dense
        # (Tc, Tb*H) presentation would trade XLU relayout per step.
        out_ref[j] = h_new.astype(out_ref.dtype)
        return h_new, c_new

    h_fin, c_fin = lax.fori_loop(0, tc, step, (h_ref[...], c_ref[...]),
                                 unroll=min(tc, 8))
    h_ref[...] = h_fin
    c_ref[...] = c_fin


def lstm_layer_pallas(xw_tbg, w_hh_t, *, time_chunk=32, batch_tile=64):
    """Sequential LSTM recurrence over a precomputed input projection.

    xw_tbg: (T, B, 4H) = x @ W_ih^T + b_ih + b_hh   (time-major, stream dtype)
    w_hh_t: (H, 4H)    = W_hh^T
    returns (T, B, H) hidden states of this layer (stream dtype).
    """
    T, B, G = xw_tbg.shape
    H = w_hh_t.shape[0]
    assert G == 4 * H

    tc = min(time_chunk, T)
    T_pad = _round_up(T, tc)
    if T_pad != T:
        # End-padding: padded steps run after all real ones within a batch
        # tile; their outputs are sliced off below.  NOTE: the carried (h, c)
        # at the very end is therefore polluted -- fine while only hidden
        # states are returned (nn.LSTM's (h_n, c_n) are not exposed here).
        xw_tbg = jnp.pad(xw_tbg, ((0, T_pad - T), (0, 0), (0, 0)))

    # Batch tiling: outer "parallel" axis (megacore sharding on v7x, DMA
    # overlap elsewhere).  Fall back to a single tile if B doesn't divide.
    tb = batch_tile if (B % batch_tile == 0) else B
    grid = (B // tb, T_pad // tc)

    out_dtype = xw_tbg.dtype

    # VMEM budget: 2x (double-buffered) xw + out blocks, weight, f32 carry,
    # with generous headroom (matters on v7x's 64 MiB VMEM at large H).
    stream_isz = jnp.dtype(out_dtype).itemsize
    needed = (2 * tc * tb * 4 * H * stream_isz          # xw blocks
              + 2 * tc * tb * H * stream_isz            # out blocks
              + 2 * H * 4 * H * jnp.dtype(w_hh_t.dtype).itemsize  # weight
              + 2 * tb * H * 4)                         # h/c carry
    vmem_limit = int(min(128 * 1024 * 1024, max(2 * needed, 8 * 1024 * 1024)))

    out = pl.pallas_call(
        _lstm_recurrent_kernel,
        out_shape=jax.ShapeDtypeStruct((T_pad, B, H), out_dtype),
        grid_spec=pltpu.PrefetchScalarGridSpec(
            num_scalar_prefetch=0,
            grid=grid,
            in_specs=[
                pl.BlockSpec((tc, tb, 4 * H), lambda b, t: (t, b, 0)),
                # Constant-index block: fetched once by the pipeline before
                # step 0, kept resident -- no blocking weight DMA in front of
                # the first chunk's compute.  For v7x / very large H, use
                # memory_space=pl.ANY + a one-time manual copy into a bf16
                # single-buffered VMEM scratch instead.
                pl.BlockSpec((H, 4 * H), lambda b, t: (0, 0)),
            ],
            out_specs=pl.BlockSpec((tc, tb, H), lambda b, t: (t, b, 0)),
            scratch_shapes=[
                pltpu.VMEM((tb, H), jnp.float32),   # h carry (f32)
                pltpu.VMEM((tb, H), jnp.float32),   # c carry (f32)
            ],
        ),
        compiler_params=pltpu.CompilerParams(
            dimension_semantics=("parallel", "arbitrary"),
            vmem_limit_bytes=vmem_limit),
    )(xw_tbg, w_hh_t)
    return out[:T]


def init_lstm_params(key, input_dim, hidden_size, num_layers):
    """Deterministic init matching nn.LSTM shapes (uniform(-1/sqrt(H), 1/sqrt(H)))."""
    params = []
    bound = 1.0 / np.sqrt(hidden_size)
    for layer in range(num_layers):
        d_in = input_dim if layer == 0 else hidden_size
        key, k1, k2, k3, k4 = jax.random.split(key, 5)
        w_ih = jax.random.uniform(k1, (4 * hidden_size, d_in), jnp.float32,
                                  -bound, bound)
        w_hh = jax.random.uniform(k2, (4 * hidden_size, hidden_size),
                                  jnp.float32, -bound, bound)
        b_ih = jax.random.uniform(k3, (4 * hidden_size,), jnp.float32,
                                  -bound, bound)
        b_hh = jax.random.uniform(k4, (4 * hidden_size,), jnp.float32,
                                  -bound, bound)
        params.append((w_ih, w_hh, b_ih, b_hh))
    return params


def prepare_lstm_params(params, *, param_dtype=jnp.float32):
    """One-time layout prep (weight transposes + bias folding), hoisted out of
    the per-call forward path.  For v7x / large H, pass param_dtype=bf16 to
    halve the resident W_hh footprint (MXU takes bf16 natively)."""
    prepped = []
    for (w_ih, w_hh, b_ih, b_hh) in params:
        prepped.append((
            jnp.transpose(w_ih).astype(param_dtype),      # (D, 4H) = W_ih^T
            jnp.transpose(w_hh).astype(param_dtype),      # (H, 4H) = W_hh^T
            (b_ih + b_hh).reshape(1, 1, -1).astype(jnp.float32),  # (1,1,4H)
        ))
    return prepped


def lstm_dynamics_forward(x_btd, prepped_params, *, stream_dtype=jnp.bfloat16):
    """Equivalent of LSTMDynamics.forward: all hidden states of the last
    layer, shape (B, T, H), float32."""
    B = x_btd.shape[0]
    # Pad batch once to the streaming sublane tile (16 for bf16, 8 for f32);
    # sliced off at the end.
    sub = 16 if jnp.dtype(stream_dtype) == jnp.dtype(jnp.bfloat16) else 8
    B_pad = _round_up(B, sub)
    x = x_btd
    if B_pad != B:
        x = jnp.pad(x, ((0, B_pad - B), (0, 0), (0, 0)))

    h_tbd = jnp.transpose(x, (1, 0, 2))            # (T, Bp, D), once per call
    for (w_ih_t, w_hh_t, bias) in prepped_params:
        # Hoisted input projection: one big MXU matmul over all timesteps,
        # f32 accumulation, streamed into the kernel in bf16.
        xw = (jnp.einsum('tbd,dg->tbg', h_tbd, w_ih_t,
                         preferred_element_type=jnp.float32)
              + bias).astype(stream_dtype)
        h_tbd = lstm_layer_pallas(xw, w_hh_t)      # (T, Bp, H) stream dtype
    out = jnp.transpose(h_tbd, (1, 0, 2))          # (Bp, T, H), once per call
    return out[:B].astype(jnp.float32)


def lstm_dynamics_reference(x_btd, params):
    """Pure-JAX reference (PyTorch LSTM semantics, gate order i,f,g,o), f32."""
    B = x_btd.shape[0]
    out = x_btd
    for (w_ih, w_hh, b_ih, b_hh) in params:
        H = w_hh.shape[1]
        h = jnp.zeros((B, H), jnp.float32)
        c = jnp.zeros((B, H), jnp.float32)
        ys = []
        for t in range(out.shape[1]):
            gates = out[:, t, :] @ w_ih.T + b_ih + h @ w_hh.T + b_hh
            i = jax.nn.sigmoid(gates[:, 0 * H:1 * H])
            f = jax.nn.sigmoid(gates[:, 1 * H:2 * H])
            g = jnp.tanh(gates[:, 2 * H:3 * H])
            o = jax.nn.sigmoid(gates[:, 3 * H:4 * H])
            c = f * c + i * g
            h = o * jnp.tanh(c)
            ys.append(h)
        out = jnp.stack(ys, axis=1)
    return out


if __name__ == "__main__":
    B, T, D, H, L = 2, 8, 4, 32, 2   # batch, seq, input_dim, hidden_size, num_layers

    key = jax.random.PRNGKey(0)
    key, kx = jax.random.split(key)
    x = jax.random.normal(kx, (B, T, D), jnp.float32)
    params = init_lstm_params(key, D, H, L)
    prepped = prepare_lstm_params(params)

    fwd = jax.jit(lstm_dynamics_forward)
    out = jax.block_until_ready(fwd(x, prepped))
    assert out.shape == (B, T, H), out.shape

    ref = lstm_dynamics_reference(x, params)
    # bf16-streamed activations with f32 recurrence/elementwise: 1e-2 covers
    # the accumulated bf16 I/O rounding (f32 streaming matches at 2e-3).
    np.testing.assert_allclose(np.asarray(out), np.asarray(ref),
                               rtol=1e-2, atol=1e-2)

    print("KERNEL_OK")
</pallas_src>

<mosaic_0001>
module attributes {stable_mosaic.version = 11 : i64} {
  func.func @_lstm_recurrent_kernel(%arg0: i32, %arg1: i32, %arg2: memref<8x16x128xbf16, #tpu.memory_space<vmem>>, %arg3: memref<32x128xf32, #tpu.memory_space<vmem>>, %arg4: memref<8x16x32xbf16, #tpu.memory_space<vmem>>, %arg5: memref<16x32xf32, #tpu.memory_space<vmem>>, %arg6: memref<16x32xf32, #tpu.memory_space<vmem>>) attributes {dimension_semantics = [#tpu.dimension_semantics<parallel>, #tpu.dimension_semantics<arbitrary>], iteration_bounds = array<i64: 1, 1>, scalar_prefetch = 0 : i64, scratch_operands = 2 : i64, tpu.core_type = #tpu.core_type<tc>, window_params = [{transform_indices = @transform_0, window_bounds = array<i64: 8, 16, 128>}, {pipeline_mode = #tpu.pipeline_mode<synchronous>, transform_indices = @transform_1, window_bounds = array<i64: 32, 128>}, {transform_indices = @transform_2, window_bounds = array<i64: 8, 16, 32>}]} {
    %c0_i32 = arith.constant 0 : i32
    %0 = arith.cmpi eq, %arg1, %c0_i32 : i32
    %1 = arith.extui %0 : i1 to i32
    %c0_i32_0 = arith.constant 0 : i32
    %2 = arith.cmpi ne, %1, %c0_i32_0 : i32
    scf.if %2 {
      %cst_58 = arith.constant 0.000000e+00 : f32
      %216 = vector.broadcast %cst_58 : f32 to vector<16x32xf32>
      %c0_59 = arith.constant 0 : index
      %c0_60 = arith.constant 0 : index
      %217 = vector.load %arg5[%c0_59, %c0_60] : memref<16x32xf32, #tpu.memory_space<vmem>>, vector<16x32xf32>
      tpu.vector_store %arg5[%c0_59, %c0_60], %216 {strides = array<i32>} : memref<16x32xf32, #tpu.memory_space<vmem>>, vector<16x32xf32>,
      %cst_61 = arith.constant 0.000000e+00 : f32
      %218 = vector.broadcast %cst_61 : f32 to vector<16x32xf32>
      %c0_62 = arith.constant 0 : index
      %c0_63 = arith.constant 0 : index
      %219 = vector.load %arg6[%c0_62, %c0_63] : memref<16x32xf32, #tpu.memory_space<vmem>>, vector<16x32xf32>
      tpu.vector_store %arg6[%c0_62, %c0_63], %218 {strides = array<i32>} : memref<16x32xf32, #tpu.memory_space<vmem>>, vector<16x32xf32>,
    } else {
    }
    %c0 = arith.constant 0 : index
    %c0_1 = arith.constant 0 : index
    %3 = vector.load %arg3[%c0, %c0_1] : memref<32x128xf32, #tpu.memory_space<vmem>>, vector<32x128xf32>
    %c0_2 = arith.constant 0 : index
    %c0_3 = arith.constant 0 : index
    %4 = vector.load %arg5[%c0_2, %c0_3] : memref<16x32xf32, #tpu.memory_space<vmem>>, vector<16x32xf32>
    %c0_4 = arith.constant 0 : index
    %c0_5 = arith.constant 0 : index
    %5 = vector.load %arg6[%c0_4, %c0_5] : memref<16x32xf32, #tpu.memory_space<vmem>>, vector<16x32xf32>
    %c0_i32_6 = arith.constant 0 : i32
    %6 = arith.index_cast %c0_i32_6 : i32 to index
    %c0_7 = arith.constant 0 : index
    %c0_8 = arith.constant 0 : index
    %7 = vector.load %arg2[%6, %c0_7, %c0_8] : memref<8x16x128xbf16, #tpu.memory_space<vmem>>, vector<1x16x128xbf16>
    %8 = vector.shape_cast %7 : vector<1x16x128xbf16> to vector<16x128xbf16>
    %9 = arith.extf %8 : vector<16x128xbf16> to vector<16x128xf32>
    %cst = arith.constant dense<0.000000e+00> : vector<16x128xf32>
    %10 = tpu.matmul %4, %3, %cst {dimension_numbers = #tpu.dot_dimension_numbers<[1], [0], [0], [1], [0, 0, 1, 1], [], []>} : vector<16x32xf32>, vector<32x128xf32>, vector<16x128xf32> -> vector<16x128xf32>
    %11 = arith.addf %9, %10 : vector<16x128xf32>
    %12 = arith.negf %11 : vector<16x128xf32>
    %13 = math.exp %12 : vector<16x128xf32>
    %cst_9 = arith.constant 1.000000e+00 : f32
    %14 = vector.broadcast %cst_9 : f32 to vector<16x128xf32>
    %15 = arith.addf %14, %13 : vector<16x128xf32>
    %16 = arith.divf %14, %15 : vector<16x128xf32>
    %17 = math.tanh %11 : vector<16x128xf32>
    %18 = vector.extract_strided_slice %16 {offsets = [0, 0], sizes = [16, 32], strides = [1, 1]} : vector<16x128xf32> to vector<16x32xf32>
    %19 = vector.extract_strided_slice %16 {offsets = [0, 32], sizes = [16, 32], strides = [1, 1]} : vector<16x128xf32> to vector<16x32xf32>
    %20 = vector.extract_strided_slice %17 {offsets = [0, 64], sizes = [16, 32], strides = [1, 1]} : vector<16x128xf32> to vector<16x32xf32>
    %21 = vector.extract_strided_slice %16 {offsets = [0, 96], sizes = [16, 32], strides = [1, 1]} : vector<16x128xf32> to vector<16x32xf32>
    %22 = arith.mulf %19, %5 : vector<16x32xf32>
    %23 = arith.mulf %18, %20 : vector<16x32xf32>
    %24 = arith.addf %22, %23 : vector<16x32xf32>
    %25 = math.tanh %24 : vector<16x32xf32>
    %26 = arith.mulf %21, %25 : vector<16x32xf32>
    %27 = arith.truncf %26 : vector<16x32xf32> to vector<16x32xbf16>
    %28 = arith.index_cast %c0_i32_6 : i32 to index
    %c0_10 = arith.constant 0 : index
    %c0_11 = arith.constant 0 : index
    %29 = vector.load %arg4[%28, %c0_10, %c0_11] : memref<8x16x32xbf16, #tpu.memory_space<vmem>>, vector<1x16x32xbf16>
    %30 = vector.shape_cast %29 : vector<1x16x32xbf16> to vector<16x32xbf16>
    %31 = vector.shape_cast %27 : vector<16x32xbf16> to vector<1x16x32xbf16>
    tpu.vector_store %arg4[%28, %c0_10, %c0_11], %31 {strides = array<i32>} : memref<8x16x32xbf16, #tpu.memory_space<vmem>>, vector<1x16x32xbf16>,
    %c1_i32 = arith.constant 1 : i32
    %32 = arith.index_cast %c1_i32 : i32 to index
    %c0_12 = arith.constant 0 : index
    %c0_13 = arith.constant 0 : index
    %33 = vector.load %arg2[%32, %c0_12, %c0_13] : memref<8x16x128xbf16, #tpu.memory_space<vmem>>, vector<1x16x128xbf16>
    %34 = vector.shape_cast %33 : vector<1x16x128xbf16> to vector<16x128xbf16>
    %35 = arith.extf %34 : vector<16x128xbf16> to vector<16x128xf32>
    %cst_14 = arith.constant dense<0.000000e+00> : vector<16x128xf32>
    %36 = tpu.matmul %26, %3, %cst_14 {dimension_numbers = #tpu.dot_dimension_numbers<[1], [0], [0], [1], [0, 0, 1, 1], [], []>} : vector<16x32xf32>, vector<32x128xf32>, vector<16x128xf32> -> vector<16x128xf32>
    %37 = arith.addf %35, %36 : vector<16x128xf32>
    %38 = arith.negf %37 : vector<16x128xf32>
    %39 = math.exp %38 : vector<16x128xf32>
    %cst_15 = arith.constant 1.000000e+00 : f32
    %40 = vector.broadcast %cst_15 : f32 to vector<16x128xf32>
    %41 = arith.addf %40, %39 : vector<16x128xf32>
    %42 = arith.divf %40, %41 : vector<16x128xf32>
    %43 = math.tanh %37 : vector<16x128xf32>
    %44 = vector.extract_strided_slice %42 {offsets = [0, 0], sizes = [16, 32], strides = [1, 1]} : vector<16x128xf32> to vector<16x32xf32>
    %45 = vector.extract_strided_slice %42 {offsets = [0, 32], sizes = [16, 32], strides = [1, 1]} : vector<16x128xf32> to vector<16x32xf32>
    %46 = vector.extract_strided_slice %43 {offsets = [0, 64], sizes = [16, 32], strides = [1, 1]} : vector<16x128xf32> to vector<16x32xf32>
    %47 = vector.extract_strided_slice %42 {offsets = [0, 96], sizes = [16, 32], strides = [1, 1]} : vector<16x128xf32> to vector<16x32xf32>
    %48 = arith.mulf %45, %24 : vector<16x32xf32>
    %49 = arith.mulf %44, %46 : vector<16x32xf32>
    %50 = arith.addf %48, %49 : vector<16x32xf32>
    %51 = math.tanh %50 : vector<16x32xf32>
    %52 = arith.mulf %47, %51 : vector<16x32xf32>
    %53 = arith.truncf %52 : vector<16x32xf32> to vector<16x32xbf16>
    %54 = arith.index_cast %c1_i32 : i32 to index
    %c0_16 = arith.constant 0 : index
    %c0_17 = arith.constant 0 : index
    %55 = vector.load %arg4[%54, %c0_16, %c0_17] : memref<8x16x32xbf16, #tpu.memory_space<vmem>>, vector<1x16x32xbf16>
    %56 = vector.shape_cast %55 : vector<1x16x32xbf16> to vector<16x32xbf16>
    %57 = vector.shape_cast %53 : vector<16x32xbf16> to vector<1x16x32xbf16>
    tpu.vector_store %arg4[%54, %c0_16, %c0_17], %57 {strides = array<i32>} : memref<8x16x32xbf16, #tpu.memory_space<vmem>>, vector<1x16x32xbf16>,
    %c2_i32 = arith.constant 2 : i32
    %58 = arith.index_cast %c2_i32 : i32 to index
    %c0_18 = arith.constant 0 : index
    %c0_19 = arith.constant 0 : index
    %59 = vector.load %arg2[%58, %c0_18, %c0_19] : memref<8x16x128xbf16, #tpu.memory_space<vmem>>, vector<1x16x128xbf16>
    %60 = vector.shape_cast %59 : vector<1x16x128xbf16> to vector<16x128xbf16>
    %61 = arith.extf %60 : vector<16x128xbf16> to vector<16x128xf32>
    %cst_20 = arith.constant dense<0.000000e+00> : vector<16x128xf32>
    %62 = tpu.matmul %52, %3, %cst_20 {dimension_numbers = #tpu.dot_dimension_numbers<[1], [0], [0], [1], [0, 0, 1, 1], [], []>} : vector<16x32xf32>, vector<32x128xf32>, vector<16x128xf32> -> vector<16x128xf32>
    %63 = arith.addf %61, %62 : vector<16x128xf32>
    %64 = arith.negf %63 : vector<16x128xf32>
    %65 = math.exp %64 : vector<16x128xf32>
    %cst_21 = arith.constant 1.000000e+00 : f32
    %66 = vector.broadcast %cst_21 : f32 to vector<16x128xf32>
    %67 = arith.addf %66, %65 : vector<16x128xf32>
    %68 = arith.divf %66, %67 : vector<16x128xf32>
    %69 = math.tanh %63 : vector<16x128xf32>
    %70 = vector.extract_strided_slice %68 {offsets = [0, 0], sizes = [16, 32], strides = [1, 1]} : vector<16x128xf32> to vector<16x32xf32>
    %71 = vector.extract_strided_slice %68 {offsets = [0, 32], sizes = [16, 32], strides = [1, 1]} : vector<16x128xf32> to vector<16x32xf32>
    %72 = vector.extract_strided_slice %69 {offsets = [0, 64], sizes = [16, 32], strides = [1, 1]} : vector<16x128xf32> to vector<16x32xf32>
    %73 = vector.extract_strided_slice %68 {offsets = [0, 96], sizes = [16, 32], strides = [1, 1]} : vector<16x128xf32> to vector<16x32xf32>
    %74 = arith.mulf %71, %50 : vector<16x32xf32>
    %75 = arith.mulf %70, %72 : vector<16x32xf32>
    %76 = arith.addf %74, %75 : vector<16x32xf32>
    %77 = math.tanh %76 : vector<16x32xf32>
    %78 = arith.mulf %73, %77 : vector<16x32xf32>
    %79 = arith.truncf %78 : vector<16x32xf32> to vector<16x32xbf16>
    %80 = arith.index_cast %c2_i32 : i32 to index
    %c0_22 = arith.constant 0 : index
    %c0_23 = arith.constant 0 : index
    %81 = vector.load %arg4[%80, %c0_22, %c0_23] : memref<8x16x32xbf16, #tpu.memory_space<vmem>>, vector<1x16x32xbf16>
    %82 = vector.shape_cast %81 : vector<1x16x32xbf16> to vector<16x32xbf16>
    %83 = vector.shape_cast %79 : vector<16x32xbf16> to vector<1x16x32xbf16>
    tpu.vector_store %arg4[%80, %c0_22, %c0_23], %83 {strides = array<i32>} : memref<8x16x32xbf16, #tpu.memory_space<vmem>>, vector<1x16x32xbf16>,
    %c3_i32 = arith.constant 3 : i32
    %84 = arith.index_cast %c3_i32 : i32 to index
    %c0_24 = arith.constant 0 : index
    %c0_25 = arith.constant 0 : index
    %85 = vector.load %arg2[%84, %c0_24, %c0_25] : memref<8x16x128xbf16, #tpu.memory_space<vmem>>, vector<1x16x128xbf16>
    %86 = vector.shape_cast %85 : vector<1x16x128xbf16> to vector<16x128xbf16>
    %87 = arith.extf %86 : vector<16x128xbf16> to vector<16x128xf32>
    %cst_26 = arith.constant dense<0.000000e+00> : vector<16x128xf32>
    %88 = tpu.matmul %78, %3, %cst_26 {dimension_numbers = #tpu.dot_dimension_numbers<[1], [0], [0], [1], [0, 0, 1, 1], [], []>} : vector<16x32xf32>, vector<32x128xf32>, vector<16x128xf32> -> vector<16x128xf32>
    %89 = arith.addf %87, %88 : vector<16x128xf32>
    %90 = arith.negf %89 : vector<16x128xf32>
    %91 = math.exp %90 : vector<16x128xf32>
    %cst_27 = arith.constant 1.000000e+00 : f32
    %92 = vector.broadcast %cst_27 : f32 to vector<16x128xf32>
    %93 = arith.addf %92, %91 : vector<16x128xf32>
    %94 = arith.divf %92, %93 : vector<16x128xf32>
    %95 = math.tanh %89 : vector<16x128xf32>
    %96 = vector.extract_strided_slice %94 {offsets = [0, 0], sizes = [16, 32], strides = [1, 1]} : vector<16x128xf32> to vector<16x32xf32>
    %97 = vector.extract_strided_slice %94 {offsets = [0, 32], sizes = [16, 32], strides = [1, 1]} : vector<16x128xf32> to vector<16x32xf32>
    %98 = vector.extract_strided_slice %95 {offsets = [0, 64], sizes = [16, 32], strides = [1, 1]} : vector<16x128xf32> to vector<16x32xf32>
    %99 = vector.extract_strided_slice %94 {offsets = [0, 96], sizes = [16, 32], strides = [1, 1]} : vector<16x128xf32> to vector<16x32xf32>
    %100 = arith.mulf %97, %76 : vector<16x32xf32>
    %101 = arith.mulf %96, %98 : vector<16x32xf32>
    %102 = arith.addf %100, %101 : vector<16x32xf32>
    %103 = math.tanh %102 : vector<16x32xf32>
    %104 = arith.mulf %99, %103 : vector<16x32xf32>
    %105 = arith.truncf %104 : vector<16x32xf32> to vector<16x32xbf16>
    %106 = arith.index_cast %c3_i32 : i32 to index
    %c0_28 = arith.constant 0 : index
    %c0_29 = arith.constant 0 : index
    %107 = vector.load %arg4[%106, %c0_28, %c0_29] : memref<8x16x32xbf16, #tpu.memory_space<vmem>>, vector<1x16x32xbf16>
    %108 = vector.shape_cast %107 : vector<1x16x32xbf16> to vector<16x32xbf16>
    %109 = vector.shape_cast %105 : vector<16x32xbf16> to vector<1x16x32xbf16>
    tpu.vector_store %arg4[%106, %c0_28, %c0_29], %109 {strides = array<i32>} : memref<8x16x32xbf16, #tpu.memory_space<vmem>>, vector<1x16x32xbf16>,
    %c4_i32 = arith.constant 4 : i32
    %110 = arith.index_cast %c4_i32 : i32 to index
    %c0_30 = arith.constant 0 : index
    %c0_31 = arith.constant 0 : index
    %111 = vector.load %arg2[%110, %c0_30, %c0_31] : memref<8x16x128xbf16, #tpu.memory_space<vmem>>, vector<1x16x128xbf16>
    %112 = vector.shape_cast %111 : vector<1x16x128xbf16> to vector<16x128xbf16>
    %113 = arith.extf %112 : vector<16x128xbf16> to vector<16x128xf32>
    %cst_32 = arith.constant dense<0.000000e+00> : vector<16x128xf32>
    %114 = tpu.matmul %104, %3, %cst_32 {dimension_numbers = #tpu.dot_dimension_numbers<[1], [0], [0], [1], [0, 0, 1, 1], [], []>} : vector<16x32xf32>, vector<32x128xf32>, vector<16x128xf32> -> vector<16x128xf32>
    %115 = arith.addf %113, %114 : vector<16x128xf32>
    %116 = arith.negf %115 : vector<16x128xf32>
    %117 = math.exp %116 : vector<16x128xf32>
    %cst_33 = arith.constant 1.000000e+00 : f32
    %118 = vector.broadcast %cst_33 : f32 to vector<16x128xf32>
    %119 = arith.addf %118, %117 : vector<16x128xf32>
    %120 = arith.divf %118, %119 : vector<16x128xf32>
    %121 = math.tanh %115 : vector<16x128xf32>
    %122 = vector.extract_strided_slice %120 {offsets = [0, 0], sizes = [16, 32], strides = [1, 1]} : vector<16x128xf32> to vector<16x32xf32>
    %123 = vector.extract_strided_slice %120 {offsets = [0, 32], sizes = [16, 32], strides = [1, 1]} : vector<16x128xf32> to vector<16x32xf32>
    %124 = vector.extract_strided_slice %121 {offsets = [0, 64], sizes = [16, 32], strides = [1, 1]} : vector<16x128xf32> to vector<16x32xf32>
    %125 = vector.extract_strided_slice %120 {offsets = [0, 96], sizes = [16, 32], strides = [1, 1]} : vector<16x128xf32> to vector<16x32xf32>
    %126 = arith.mulf %123, %102 : vector<16x32xf32>
    %127 = arith.mulf %122, %124 : vector<16x32xf32>
    %128 = arith.addf %126, %127 : vector<16x32xf32>
    %129 = math.tanh %128 : vector<16x32xf32>
    %130 = arith.mulf %125, %129 : vector<16x32xf32>
    %131 = arith.truncf %130 : vector<16x32xf32> to vector<16x32xbf16>
    %132 = arith.index_cast %c4_i32 : i32 to index
    %c0_34 = arith.constant 0 : index
    %c0_35 = arith.constant 0 : index
    %133 = vector.load %arg4[%132, %c0_34, %c0_35] : memref<8x16x32xbf16, #tpu.memory_space<vmem>>, vector<1x16x32xbf16>
    %134 = vector.shape_cast %133 : vector<1x16x32xbf16> to vector<16x32xbf16>
    %135 = vector.shape_cast %131 : vector<16x32xbf16> to vector<1x16x32xbf16>
    tpu.vector_store %arg4[%132, %c0_34, %c0_35], %135 {strides = array<i32>} : memref<8x16x32xbf16, #tpu.memory_space<vmem>>, vector<1x16x32xbf16>,
    %c5_i32 = arith.constant 5 : i32
    %136 = arith.index_cast %c5_i32 : i32 to index
    %c0_36 = arith.constant 0 : index
    %c0_37 = arith.constant 0 : index
    %137 = vector.load %arg2[%136, %c0_36, %c0_37] : memref<8x16x128xbf16, #tpu.memory_space<vmem>>, vector<1x16x128xbf16>
    %138 = vector.shape_cast %137 : vector<1x16x128xbf16> to vector<16x128xbf16>
    %139 = arith.extf %138 : vector<16x128xbf16> to vector<16x128xf32>
    %cst_38 = arith.constant dense<0.000000e+00> : vector<16x128xf32>
    %140 = tpu.matmul %130, %3, %cst_38 {dimension_numbers = #tpu.dot_dimension_numbers<[1], [0], [0], [1], [0, 0, 1, 1], [], []>} : vector<16x32xf32>, vector<32x128xf32>, vector<16x128xf32> -> vector<16x128xf32>
    %141 = arith.addf %139, %140 : vector<16x128xf32>
    %142 = arith.negf %141 : vector<16x128xf32>
    %143 = math.exp %142 : vector<16x128xf32>
    %cst_39 = arith.constant 1.000000e+00 : f32
    %144 = vector.broadcast %cst_39 : f32 to vector<16x128xf32>
    %145 = arith.addf %144, %143 : vector<16x128xf32>
    %146 = arith.divf %144, %145 : vector<16x128xf32>
    %147 = math.tanh %141 : vector<16x128xf32>
    %148 = vector.extract_strided_slice %146 {offsets = [0, 0], sizes = [16, 32], strides = [1, 1]} : vector<16x128xf32> to vector<16x32xf32>
    %149 = vector.extract_strided_slice %146 {offsets = [0, 32], sizes = [16, 32], strides = [1, 1]} : vector<16x128xf32> to vector<16x32xf32>
    %150 = vector.extract_strided_slice %147 {offsets = [0, 64], sizes = [16, 32], strides = [1, 1]} : vector<16x128xf32> to vector<16x32xf32>
    %151 = vector.extract_strided_slice %146 {offsets = [0, 96], sizes = [16, 32], strides = [1, 1]} : vector<16x128xf32> to vector<16x32xf32>
    %152 = arith.mulf %149, %128 : vector<16x32xf32>
    %153 = arith.mulf %148, %150 : vector<16x32xf32>
    %154 = arith.addf %152, %153 : vector<16x32xf32>
    %155 = math.tanh %154 : vector<16x32xf32>
    %156 = arith.mulf %151, %155 : vector<16x32xf32>
    %157 = arith.truncf %156 : vector<16x32xf32> to vector<16x32xbf16>
    %158 = arith.index_cast %c5_i32 : i32 to index
    %c0_40 = arith.constant 0 : index
    %c0_41 = arith.constant 0 : index
    %159 = vector.load %arg4[%158, %c0_40, %c0_41] : memref<8x16x32xbf16, #tpu.memory_space<vmem>>, vector<1x16x32xbf16>
    %160 = vector.shape_cast %159 : vector<1x16x32xbf16> to vector<16x32xbf16>
    %161 = vector.shape_cast %157 : vector<16x32xbf16> to vector<1x16x32xbf16>
    tpu.vector_store %arg4[%158, %c0_40, %c0_41], %161 {strides = array<i32>} : memref<8x16x32xbf16, #tpu.memory_space<vmem>>, vector<1x16x32xbf16>,
    %c6_i32 = arith.constant 6 : i32
    %162 = arith.index_cast %c6_i32 : i32 to index
    %c0_42 = arith.constant 0 : index
    %c0_43 = arith.constant 0 : index
    %163 = vector.load %arg2[%162, %c0_42, %c0_43] : memref<8x16x128xbf16, #tpu.memory_space<vmem>>, vector<1x16x128xbf16>
    %164 = vector.shape_cast %163 : vector<1x16x128xbf16> to vector<16x128xbf16>
    %165 = arith.extf %164 : vector<16x128xbf16> to vector<16x128xf32>
    %cst_44 = arith.constant dense<0.000000e+00> : vector<16x128xf32>
    %166 = tpu.matmul %156, %3, %cst_44 {dimension_numbers = #tpu.dot_dimension_numbers<[1], [0], [0], [1], [0, 0, 1, 1], [], []>} : vector<16x32xf32>, vector<32x128xf32>, vector<16x128xf32> -> vector<16x128xf32>
    %167 = arith.addf %165, %166 : vector<16x128xf32>
    %168 = arith.negf %167 : vector<16x128xf32>
    %169 = math.exp %168 : vector<16x128xf32>
    %cst_45 = arith.constant 1.000000e+00 : f32
    %170 = vector.broadcast %cst_45 : f32 to vector<16x128xf32>
    %171 = arith.addf %170, %169 : vector<16x128xf32>
    %172 = arith.divf %170, %171 : vector<16x128xf32>
    %173 = math.tanh %167 : vector<16x128xf32>
    %174 = vector.extract_strided_slice %172 {offsets = [0, 0], sizes = [16, 32], strides = [1, 1]} : vector<16x128xf32> to vector<16x32xf32>
    %175 = vector.extract_strided_slice %172 {offsets = [0, 32], sizes = [16, 32], strides = [1, 1]} : vector<16x128xf32> to vector<16x32xf32>
    %176 = vector.extract_strided_slice %173 {offsets = [0, 64], sizes = [16, 32], strides = [1, 1]} : vector<16x128xf32> to vector<16x32xf32>
    %177 = vector.extract_strided_slice %172 {offsets = [0, 96], sizes = [16, 32], strides = [1, 1]} : vector<16x128xf32> to vector<16x32xf32>
    %178 = arith.mulf %175, %154 : vector<16x32xf32>
    %179 = arith.mulf %174, %176 : vector<16x32xf32>
    %180 = arith.addf %178, %179 : vector<16x32xf32>
    %181 = math.tanh %180 : vector<16x32xf32>
    %182 = arith.mulf %177, %181 : vector<16x32xf32>
    %183 = arith.truncf %182 : vector<16x32xf32> to vector<16x32xbf16>
    %184 = arith.index_cast %c6_i32 : i32 to index
    %c0_46 = arith.constant 0 : index
    %c0_47 = arith.constant 0 : index
    %185 = vector.load %arg4[%184, %c0_46, %c0_47] : memref<8x16x32xbf16, #tpu.memory_space<vmem>>, vector<1x16x32xbf16>
    %186 = vector.shape_cast %185 : vector<1x16x32xbf16> to vector<16x32xbf16>
    %187 = vector.shape_cast %183 : vector<16x32xbf16> to vector<1x16x32xbf16>
    tpu.vector_store %arg4[%184, %c0_46, %c0_47], %187 {strides = array<i32>} : memref<8x16x32xbf16, #tpu.memory_space<vmem>>, vector<1x16x32xbf16>,
    %c7_i32 = arith.constant 7 : i32
    %188 = arith.index_cast %c7_i32 : i32 to index
    %c0_48 = arith.constant 0 : index
    %c0_49 = arith.constant 0 : index
    %189 = vector.load %arg2[%188, %c0_48, %c0_49] : memref<8x16x128xbf16, #tpu.memory_space<vmem>>, vector<1x16x128xbf16>
    %190 = vector.shape_cast %189 : vector<1x16x128xbf16> to vector<16x128xbf16>
    %191 = arith.extf %190 : vector<16x128xbf16> to vector<16x128xf32>
    %cst_50 = arith.constant dense<0.000000e+00> : vector<16x128xf32>
    %192 = tpu.matmul %182, %3, %cst_50 {dimension_numbers = #tpu.dot_dimension_numbers<[1], [0], [0], [1], [0, 0, 1, 1], [], []>} : vector<16x32xf32>, vector<32x128xf32>, vector<16x128xf32> -> vector<16x128xf32>
    %193 = arith.addf %191, %192 : vector<16x128xf32>
    %194 = arith.negf %193 : vector<16x128xf32>
    %195 = math.exp %194 : vector<16x128xf32>
    %cst_51 = arith.constant 1.000000e+00 : f32
    %196 = vector.broadcast %cst_51 : f32 to vector<16x128xf32>
    %197 = arith.addf %196, %195 : vector<16x128xf32>
    %198 = arith.divf %196, %197 : vector<16x128xf32>
    %199 = math.tanh %193 : vector<16x128xf32>
    %200 = vector.extract_strided_slice %198 {offsets = [0, 0], sizes = [16, 32], strides = [1, 1]} : vector<16x128xf32> to vector<16x32xf32>
    %201 = vector.extract_strided_slice %198 {offsets = [0, 32], sizes = [16, 32], strides = [1, 1]} : vector<16x128xf32> to vector<16x32xf32>
    %202 = vector.extract_strided_slice %199 {offsets = [0, 64], sizes = [16, 32], strides = [1, 1]} : vector<16x128xf32> to vector<16x32xf32>
    %203 = vector.extract_strided_slice %198 {offsets = [0, 96], sizes = [16, 32], strides = [1, 1]} : vector<16x128xf32> to vector<16x32xf32>
    %204 = arith.mulf %201, %180 : vector<16x32xf32>
    %205 = arith.mulf %200, %202 : vector<16x32xf32>
    %206 = arith.addf %204, %205 : vector<16x32xf32>
    %207 = math.tanh %206 : vector<16x32xf32>
    %208 = arith.mulf %203, %207 : vector<16x32xf32>
    %209 = arith.truncf %208 : vector<16x32xf32> to vector<16x32xbf16>
    %210 = arith.index_cast %c7_i32 : i32 to index
    %c0_52 = arith.constant 0 : index
    %c0_53 = arith.constant 0 : index
    %211 = vector.load %arg4[%210, %c0_52, %c0_53] : memref<8x16x32xbf16, #tpu.memory_space<vmem>>, vector<1x16x32xbf16>
    %212 = vector.shape_cast %211 : vector<1x16x32xbf16> to vector<16x32xbf16>
    %213 = vector.shape_cast %209 : vector<16x32xbf16> to vector<1x16x32xbf16>
    tpu.vector_store %arg4[%210, %c0_52, %c0_53], %213 {strides = array<i32>} : memref<8x16x32xbf16, #tpu.memory_space<vmem>>, vector<1x16x32xbf16>,
    %c8_i32 = arith.constant 8 : i32
    %c0_54 = arith.constant 0 : index
    %c0_55 = arith.constant 0 : index
    %214 = vector.load %arg5[%c0_54, %c0_55] : memref<16x32xf32, #tpu.memory_space<vmem>>, vector<16x32xf32>
    tpu.vector_store %arg5[%c0_54, %c0_55], %208 {strides = array<i32>} : memref<16x32xf32, #tpu.memory_space<vmem>>, vector<16x32xf32>,
    %c0_56 = arith.constant 0 : index
    %c0_57 = arith.constant 0 : index
    %215 = vector.load %arg6[%c0_56, %c0_57] : memref<16x32xf32, #tpu.memory_space<vmem>>, vector<16x32xf32>
    tpu.vector_store %arg6[%c0_56, %c0_57], %206 {strides = array<i32>} : memref<16x32xf32, #tpu.memory_space<vmem>>, vector<16x32xf32>,
    return
  }
  func.func @transform_0(%arg0: i32, %arg1: i32) -> (i32, i32, i32) {
    %c0_i32 = arith.constant 0 : i32
    %c0_i32_0 = arith.constant 0 : i32
    return %arg1, %arg0, %c0_i32 : i32, i32, i32
  }
  func.func @transform_1(%arg0: i32, %arg1: i32) -> (i32, i32) {
    %c0_i32 = arith.constant 0 : i32
    %c0_i32_0 = arith.constant 0 : i32
    %c0_i32_1 = arith.constant 0 : i32
    return %c0_i32, %c0_i32_0 : i32, i32
  }
  func.func @transform_2(%arg0: i32, %arg1: i32) -> (i32, i32, i32) {
    %c0_i32 = arith.constant 0 : i32
    %c0_i32_0 = arith.constant 0 : i32
    return %arg1, %arg0, %c0_i32 : i32, i32, i32
  }
}

module attributes {stable_mosaic.version = 11 : i64} {
  func.func @_lstm_recurrent_kernel(%arg0: i32, %arg1: i32, %arg2: memref<8x16x128xbf16, #tpu.memory_space<vmem>>, %arg3: memref<32x128xf32, #tpu.memory_space<vmem>>, %arg4: memref<8x16x32xbf16, #tpu.memory_space<vmem>>, %arg5: memref<16x32xf32, #tpu.memory_space<vmem>>, %arg6: memref<16x32xf32, #tpu.memory_space<vmem>>) attributes {dimension_semantics = [#tpu.dimension_semantics<parallel>, #tpu.dimension_semantics<arbitrary>], iteration_bounds = array<i64: 1, 1>, scalar_prefetch = 0 : i64, scratch_operands = 2 : i64, tpu.core_type = #tpu.core_type<tc>, window_params = [{transform_indices = @transform_0, window_bounds = array<i64: 8, 16, 128>}, {pipeline_mode = #tpu.pipeline_mode<synchronous>, transform_indices = @transform_1, window_bounds = array<i64: 32, 128>}, {transform_indices = @transform_2, window_bounds = array<i64: 8, 16, 32>}]} {
    %c0_i32 = arith.constant 0 : i32
    %0 = arith.cmpi eq, %arg1, %c0_i32 : i32
    %1 = arith.extui %0 : i1 to i32
    %c0_i32_0 = arith.constant 0 : i32
    %2 = arith.cmpi ne, %1, %c0_i32_0 : i32
    scf.if %2 {
      %cst_58 = arith.constant 0.000000e+00 : f32
      %216 = vector.broadcast %cst_58 : f32 to vector<16x32xf32>
      %c0_59 = arith.constant 0 : index
      %c0_60 = arith.constant 0 : index
      %217 = vector.load %arg5[%c0_59, %c0_60] : memref<16x32xf32, #tpu.memory_space<vmem>>, vector<16x32xf32>
      tpu.vector_store %arg5[%c0_59, %c0_60], %216 {strides = array<i32>} : memref<16x32xf32, #tpu.memory_space<vmem>>, vector<16x32xf32>,
      %cst_61 = arith.constant 0.000000e+00 : f32
      %218 = vector.broadcast %cst_61 : f32 to vector<16x32xf32>
      %c0_62 = arith.constant 0 : index
      %c0_63 = arith.constant 0 : index
      %219 = vector.load %arg6[%c0_62, %c0_63] : memref<16x32xf32, #tpu.memory_space<vmem>>, vector<16x32xf32>
      tpu.vector_store %arg6[%c0_62, %c0_63], %218 {strides = array<i32>} : memref<16x32xf32, #tpu.memory_space<vmem>>, vector<16x32xf32>,
    } else {
    }
    %c0 = arith.constant 0 : index
    %c0_1 = arith.constant 0 : index
    %3 = vector.load %arg3[%c0, %c0_1] : memref<32x128xf32, #tpu.memory_space<vmem>>, vector<32x128xf32>
    %c0_2 = arith.constant 0 : index
    %c0_3 = arith.constant 0 : index
    %4 = vector.load %arg5[%c0_2, %c0_3] : memref<16x32xf32, #tpu.memory_space<vmem>>, vector<16x32xf32>
    %c0_4 = arith.constant 0 : index
    %c0_5 = arith.constant 0 : index
    %5 = vector.load %arg6[%c0_4, %c0_5] : memref<16x32xf32, #tpu.memory_space<vmem>>, vector<16x32xf32>
    %c0_i32_6 = arith.constant 0 : i32
    %6 = arith.index_cast %c0_i32_6 : i32 to index
    %c0_7 = arith.constant 0 : index
    %c0_8 = arith.constant 0 : index
    %7 = vector.load %arg2[%6, %c0_7, %c0_8] : memref<8x16x128xbf16, #tpu.memory_space<vmem>>, vector<1x16x128xbf16>
    %8 = vector.shape_cast %7 : vector<1x16x128xbf16> to vector<16x128xbf16>
    %9 = arith.extf %8 : vector<16x128xbf16> to vector<16x128xf32>
    %cst = arith.constant dense<0.000000e+00> : vector<16x128xf32>
    %10 = tpu.matmul %4, %3, %cst {dimension_numbers = #tpu.dot_dimension_numbers<[1], [0], [0], [1], [0, 0, 1, 1], [], []>} : vector<16x32xf32>, vector<32x128xf32>, vector<16x128xf32> -> vector<16x128xf32>
    %11 = arith.addf %9, %10 : vector<16x128xf32>
    %12 = arith.negf %11 : vector<16x128xf32>
    %13 = math.exp %12 : vector<16x128xf32>
    %cst_9 = arith.constant 1.000000e+00 : f32
    %14 = vector.broadcast %cst_9 : f32 to vector<16x128xf32>
    %15 = arith.addf %14, %13 : vector<16x128xf32>
    %16 = arith.divf %14, %15 : vector<16x128xf32>
    %17 = math.tanh %11 : vector<16x128xf32>
    %18 = vector.extract_strided_slice %16 {offsets = [0, 0], sizes = [16, 32], strides = [1, 1]} : vector<16x128xf32> to vector<16x32xf32>
    %19 = vector.extract_strided_slice %16 {offsets = [0, 32], sizes = [16, 32], strides = [1, 1]} : vector<16x128xf32> to vector<16x32xf32>
    %20 = vector.extract_strided_slice %17 {offsets = [0, 64], sizes = [16, 32], strides = [1, 1]} : vector<16x128xf32> to vector<16x32xf32>
    %21 = vector.extract_strided_slice %16 {offsets = [0, 96], sizes = [16, 32], strides = [1, 1]} : vector<16x128xf32> to vector<16x32xf32>
    %22 = arith.mulf %19, %5 : vector<16x32xf32>
    %23 = arith.mulf %18, %20 : vector<16x32xf32>
    %24 = arith.addf %22, %23 : vector<16x32xf32>
    %25 = math.tanh %24 : vector<16x32xf32>
    %26 = arith.mulf %21, %25 : vector<16x32xf32>
    %27 = arith.truncf %26 : vector<16x32xf32> to vector<16x32xbf16>
    %28 = arith.index_cast %c0_i32_6 : i32 to index
    %c0_10 = arith.constant 0 : index
    %c0_11 = arith.constant 0 : index
    %29 = vector.load %arg4[%28, %c0_10, %c0_11] : memref<8x16x32xbf16, #tpu.memory_space<vmem>>, vector<1x16x32xbf16>
    %30 = vector.shape_cast %29 : vector<1x16x32xbf16> to vector<16x32xbf16>
    %31 = vector.shape_cast %27 : vector<16x32xbf16> to vector<1x16x32xbf16>
    tpu.vector_store %arg4[%28, %c0_10, %c0_11], %31 {strides = array<i32>} : memref<8x16x32xbf16, #tpu.memory_space<vmem>>, vector<1x16x32xbf16>,
    %c1_i32 = arith.constant 1 : i32
    %32 = arith.index_cast %c1_i32 : i32 to index
    %c0_12 = arith.constant 0 : index
    %c0_13 = arith.constant 0 : index
    %33 = vector.load %arg2[%32, %c0_12, %c0_13] : memref<8x16x128xbf16, #tpu.memory_space<vmem>>, vector<1x16x128xbf16>
    %34 = vector.shape_cast %33 : vector<1x16x128xbf16> to vector<16x128xbf16>
    %35 = arith.extf %34 : vector<16x128xbf16> to vector<16x128xf32>
    %cst_14 = arith.constant dense<0.000000e+00> : vector<16x128xf32>
    %36 = tpu.matmul %26, %3, %cst_14 {dimension_numbers = #tpu.dot_dimension_numbers<[1], [0], [0], [1], [0, 0, 1, 1], [], []>} : vector<16x32xf32>, vector<32x128xf32>, vector<16x128xf32> -> vector<16x128xf32>
    %37 = arith.addf %35, %36 : vector<16x128xf32>
    %38 = arith.negf %37 : vector<16x128xf32>
    %39 = math.exp %38 : vector<16x128xf32>
    %cst_15 = arith.constant 1.000000e+00 : f32
    %40 = vector.broadcast %cst_15 : f32 to vector<16x128xf32>
    %41 = arith.addf %40, %39 : vector<16x128xf32>
    %42 = arith.divf %40, %41 : vector<16x128xf32>
    %43 = math.tanh %37 : vector<16x128xf32>
    %44 = vector.extract_strided_slice %42 {offsets = [0, 0], sizes = [16, 32], strides = [1, 1]} : vector<16x128xf32> to vector<16x32xf32>
    %45 = vector.extract_strided_slice %42 {offsets = [0, 32], sizes = [16, 32], strides = [1, 1]} : vector<16x128xf32> to vector<16x32xf32>
    %46 = vector.extract_strided_slice %43 {offsets = [0, 64], sizes = [16, 32], strides = [1, 1]} : vector<16x128xf32> to vector<16x32xf32>
    %47 = vector.extract_strided_slice %42 {offsets = [0, 96], sizes = [16, 32], strides = [1, 1]} : vector<16x128xf32> to vector<16x32xf32>
    %48 = arith.mulf %45, %24 : vector<16x32xf32>
    %49 = arith.mulf %44, %46 : vector<16x32xf32>
    %50 = arith.addf %48, %49 : vector<16x32xf32>
    %51 = math.tanh %50 : vector<16x32xf32>
    %52 = arith.mulf %47, %51 : vector<16x32xf32>
    %53 = arith.truncf %52 : vector<16x32xf32> to vector<16x32xbf16>
    %54 = arith.index_cast %c1_i32 : i32 to index
    %c0_16 = arith.constant 0 : index
    %c0_17 = arith.constant 0 : index
    %55 = vector.load %arg4[%54, %c0_16, %c0_17] : memref<8x16x32xbf16, #tpu.memory_space<vmem>>, vector<1x16x32xbf16>
    %56 = vector.shape_cast %55 : vector<1x16x32xbf16> to vector<16x32xbf16>
    %57 = vector.shape_cast %53 : vector<16x32xbf16> to vector<1x16x32xbf16>
    tpu.vector_store %arg4[%54, %c0_16, %c0_17], %57 {strides = array<i32>} : memref<8x16x32xbf16, #tpu.memory_space<vmem>>, vector<1x16x32xbf16>,
    %c2_i32 = arith.constant 2 : i32
    %58 = arith.index_cast %c2_i32 : i32 to index
    %c0_18 = arith.constant 0 : index
    %c0_19 = arith.constant 0 : index
    %59 = vector.load %arg2[%58, %c0_18, %c0_19] : memref<8x16x128xbf16, #tpu.memory_space<vmem>>, vector<1x16x128xbf16>
    %60 = vector.shape_cast %59 : vector<1x16x128xbf16> to vector<16x128xbf16>
    %61 = arith.extf %60 : vector<16x128xbf16> to vector<16x128xf32>
    %cst_20 = arith.constant dense<0.000000e+00> : vector<16x128xf32>
    %62 = tpu.matmul %52, %3, %cst_20 {dimension_numbers = #tpu.dot_dimension_numbers<[1], [0], [0], [1], [0, 0, 1, 1], [], []>} : vector<16x32xf32>, vector<32x128xf32>, vector<16x128xf32> -> vector<16x128xf32>
    %63 = arith.addf %61, %62 : vector<16x128xf32>
    %64 = arith.negf %63 : vector<16x128xf32>
    %65 = math.exp %64 : vector<16x128xf32>
    %cst_21 = arith.constant 1.000000e+00 : f32
    %66 = vector.broadcast %cst_21 : f32 to vector<16x128xf32>
    %67 = arith.addf %66, %65 : vector<16x128xf32>
    %68 = arith.divf %66, %67 : vector<16x128xf32>
    %69 = math.tanh %63 : vector<16x128xf32>
    %70 = vector.extract_strided_slice %68 {offsets = [0, 0], sizes = [16, 32], strides = [1, 1]} : vector<16x128xf32> to vector<16x32xf32>
    %71 = vector.extract_strided_slice %68 {offsets = [0, 32], sizes = [16, 32], strides = [1, 1]} : vector<16x128xf32> to vector<16x32xf32>
    %72 = vector.extract_strided_slice %69 {offsets = [0, 64], sizes = [16, 32], strides = [1, 1]} : vector<16x128xf32> to vector<16x32xf32>
    %73 = vector.extract_strided_slice %68 {offsets = [0, 96], sizes = [16, 32], strides = [1, 1]} : vector<16x128xf32> to vector<16x32xf32>
    %74 = arith.mulf %71, %50 : vector<16x32xf32>
    %75 = arith.mulf %70, %72 : vector<16x32xf32>
    %76 = arith.addf %74, %75 : vector<16x32xf32>
    %77 = math.tanh %76 : vector<16x32xf32>
    %78 = arith.mulf %73, %77 : vector<16x32xf32>
    %79 = arith.truncf %78 : vector<16x32xf32> to vector<16x32xbf16>
    %80 = arith.index_cast %c2_i32 : i32 to index
    %c0_22 = arith.constant 0 : index
    %c0_23 = arith.constant 0 : index
    %81 = vector.load %arg4[%80, %c0_22, %c0_23] : memref<8x16x32xbf16, #tpu.memory_space<vmem>>, vector<1x16x32xbf16>
    %82 = vector.shape_cast %81 : vector<1x16x32xbf16> to vector<16x32xbf16>
    %83 = vector.shape_cast %79 : vector<16x32xbf16> to vector<1x16x32xbf16>
    tpu.vector_store %arg4[%80, %c0_22, %c0_23], %83 {strides = array<i32>} : memref<8x16x32xbf16, #tpu.memory_space<vmem>>, vector<1x16x32xbf16>,
    %c3_i32 = arith.constant 3 : i32
    %84 = arith.index_cast %c3_i32 : i32 to index
    %c0_24 = arith.constant 0 : index
    %c0_25 = arith.constant 0 : index
    %85 = vector.load %arg2[%84, %c0_24, %c0_25] : memref<8x16x128xbf16, #tpu.memory_space<vmem>>, vector<1x16x128xbf16>
    %86 = vector.shape_cast %85 : vector<1x16x128xbf16> to vector<16x128xbf16>
    %87 = arith.extf %86 : vector<16x128xbf16> to vector<16x128xf32>
    %cst_26 = arith.constant dense<0.000000e+00> : vector<16x128xf32>
    %88 = tpu.matmul %78, %3, %cst_26 {dimension_numbers = #tpu.dot_dimension_numbers<[1], [0], [0], [1], [0, 0, 1, 1], [], []>} : vector<16x32xf32>, vector<32x128xf32>, vector<16x128xf32> -> vector<16x128xf32>
    %89 = arith.addf %87, %88 : vector<16x128xf32>
    %90 = arith.negf %89 : vector<16x128xf32>
    %91 = math.exp %90 : vector<16x128xf32>
    %cst_27 = arith.constant 1.000000e+00 : f32
    %92 = vector.broadcast %cst_27 : f32 to vector<16x128xf32>
    %93 = arith.addf %92, %91 : vector<16x128xf32>
    %94 = arith.divf %92, %93 : vector<16x128xf32>
    %95 = math.tanh %89 : vector<16x128xf32>
    %96 = vector.extract_strided_slice %94 {offsets = [0, 0], sizes = [16, 32], strides = [1, 1]} : vector<16x128xf32> to vector<16x32xf32>
    %97 = vector.extract_strided_slice %94 {offsets = [0, 32], sizes = [16, 32], strides = [1, 1]} : vector<16x128xf32> to vector<16x32xf32>
    %98 = vector.extract_strided_slice %95 {offsets = [0, 64], sizes = [16, 32], strides = [1, 1]} : vector<16x128xf32> to vector<16x32xf32>
    %99 = vector.extract_strided_slice %94 {offsets = [0, 96], sizes = [16, 32], strides = [1, 1]} : vector<16x128xf32> to vector<16x32xf32>
    %100 = arith.mulf %97, %76 : vector<16x32xf32>
    %101 = arith.mulf %96, %98 : vector<16x32xf32>
    %102 = arith.addf %100, %101 : vector<16x32xf32>
    %103 = math.tanh %102 : vector<16x32xf32>
    %104 = arith.mulf %99, %103 : vector<16x32xf32>
    %105 = arith.truncf %104 : vector<16x32xf32> to vector<16x32xbf16>
    %106 = arith.index_cast %c3_i32 : i32 to index
    %c0_28 = arith.constant 0 : index
    %c0_29 = arith.constant 0 : index
    %107 = vector.load %arg4[%106, %c0_28, %c0_29] : memref<8x16x32xbf16, #tpu.memory_space<vmem>>, vector<1x16x32xbf16>
    %108 = vector.shape_cast %107 : vector<1x16x32xbf16> to vector<16x32xbf16>
    %109 = vector.shape_cast %105 : vector<16x32xbf16> to vector<1x16x32xbf16>
    tpu.vector_store %arg4[%106, %c0_28, %c0_29], %109 {strides = array<i32>} : memref<8x16x32xbf16, #tpu.memory_space<vmem>>, vector<1x16x32xbf16>,
    %c4_i32 = arith.constant 4 : i32
    %110 = arith.index_cast %c4_i32 : i32 to index
    %c0_30 = arith.constant 0 : index
    %c0_31 = arith.constant 0 : index
    %111 = vector.load %arg2[%110, %c0_30, %c0_31] : memref<8x16x128xbf16, #tpu.memory_space<vmem>>, vector<1x16x128xbf16>
    %112 = vector.shape_cast %111 : vector<1x16x128xbf16> to vector<16x128xbf16>
    %113 = arith.extf %112 : vector<16x128xbf16> to vector<16x128xf32>
    %cst_32 = arith.constant dense<0.000000e+00> : vector<16x128xf32>
    %114 = tpu.matmul %104, %3, %cst_32 {dimension_numbers = #tpu.dot_dimension_numbers<[1], [0], [0], [1], [0, 0, 1, 1], [], []>} : vector<16x32xf32>, vector<32x128xf32>, vector<16x128xf32> -> vector<16x128xf32>
    %115 = arith.addf %113, %114 : vector<16x128xf32>
    %116 = arith.negf %115 : vector<16x128xf32>
    %117 = math.exp %116 : vector<16x128xf32>
    %cst_33 = arith.constant 1.000000e+00 : f32
    %118 = vector.broadcast %cst_33 : f32 to vector<16x128xf32>
    %119 = arith.addf %118, %117 : vector<16x128xf32>
    %120 = arith.divf %118, %119 : vector<16x128xf32>
    %121 = math.tanh %115 : vector<16x128xf32>
    %122 = vector.extract_strided_slice %120 {offsets = [0, 0], sizes = [16, 32], strides = [1, 1]} : vector<16x128xf32> to vector<16x32xf32>
    %123 = vector.extract_strided_slice %120 {offsets = [0, 32], sizes = [16, 32], strides = [1, 1]} : vector<16x128xf32> to vector<16x32xf32>
    %124 = vector.extract_strided_slice %121 {offsets = [0, 64], sizes = [16, 32], strides = [1, 1]} : vector<16x128xf32> to vector<16x32xf32>
    %125 = vector.extract_strided_slice %120 {offsets = [0, 96], sizes = [16, 32], strides = [1, 1]} : vector<16x128xf32> to vector<16x32xf32>
    %126 = arith.mulf %123, %102 : vector<16x32xf32>
    %127 = arith.mulf %122, %124 : vector<16x32xf32>
    %128 = arith.addf %126, %127 : vector<16x32xf32>
    %129 = math.tanh %128 : vector<16x32xf32>
    %130 = arith.mulf %125, %129 : vector<16x32xf32>
    %131 = arith.truncf %130 : vector<16x32xf32> to vector<16x32xbf16>
    %132 = arith.index_cast %c4_i32 : i32 to index
    %c0_34 = arith.constant 0 : index
    %c0_35 = arith.constant 0 : index
    %133 = vector.load %arg4[%132, %c0_34, %c0_35] : memref<8x16x32xbf16, #tpu.memory_space<vmem>>, vector<1x16x32xbf16>
    %134 = vector.shape_cast %133 : vector<1x16x32xbf16> to vector<16x32xbf16>
    %135 = vector.shape_cast %131 : vector<16x32xbf16> to vector<1x16x32xbf16>
    tpu.vector_store %arg4[%132, %c0_34, %c0_35], %135 {strides = array<i32>} : memref<8x16x32xbf16, #tpu.memory_space<vmem>>, vector<1x16x32xbf16>,
    %c5_i32 = arith.constant 5 : i32
    %136 = arith.index_cast %c5_i32 : i32 to index
    %c0_36 = arith.constant 0 : index
    %c0_37 = arith.constant 0 : index
    %137 = vector.load %arg2[%136, %c0_36, %c0_37] : memref<8x16x128xbf16, #tpu.memory_space<vmem>>, vector<1x16x128xbf16>
    %138 = vector.shape_cast %137 : vector<1x16x128xbf16> to vector<16x128xbf16>
    %139 = arith.extf %138 : vector<16x128xbf16> to vector<16x128xf32>
    %cst_38 = arith.constant dense<0.000000e+00> : vector<16x128xf32>
    %140 = tpu.matmul %130, %3, %cst_38 {dimension_numbers = #tpu.dot_dimension_numbers<[1], [0], [0], [1], [0, 0, 1, 1], [], []>} : vector<16x32xf32>, vector<32x128xf32>, vector<16x128xf32> -> vector<16x128xf32>
    %141 = arith.addf %139, %140 : vector<16x128xf32>
    %142 = arith.negf %141 : vector<16x128xf32>
    %143 = math.exp %142 : vector<16x128xf32>
    %cst_39 = arith.constant 1.000000e+00 : f32
    %144 = vector.broadcast %cst_39 : f32 to vector<16x128xf32>
    %145 = arith.addf %144, %143 : vector<16x128xf32>
    %146 = arith.divf %144, %145 : vector<16x128xf32>
    %147 = math.tanh %141 : vector<16x128xf32>
    %148 = vector.extract_strided_slice %146 {offsets = [0, 0], sizes = [16, 32], strides = [1, 1]} : vector<16x128xf32> to vector<16x32xf32>
    %149 = vector.extract_strided_slice %146 {offsets = [0, 32], sizes = [16, 32], strides = [1, 1]} : vector<16x128xf32> to vector<16x32xf32>
    %150 = vector.extract_strided_slice %147 {offsets = [0, 64], sizes = [16, 32], strides = [1, 1]} : vector<16x128xf32> to vector<16x32xf32>
    %151 = vector.extract_strided_slice %146 {offsets = [0, 96], sizes = [16, 32], strides = [1, 1]} : vector<16x128xf32> to vector<16x32xf32>
    %152 = arith.mulf %149, %128 : vector<16x32xf32>
    %153 = arith.mulf %148, %150 : vector<16x32xf32>
    %154 = arith.addf %152, %153 : vector<16x32xf32>
    %155 = math.tanh %154 : vector<16x32xf32>
    %156 = arith.mulf %151, %155 : vector<16x32xf32>
    %157 = arith.truncf %156 : vector<16x32xf32> to vector<16x32xbf16>
    %158 = arith.index_cast %c5_i32 : i32 to index
    %c0_40 = arith.constant 0 : index
    %c0_41 = arith.constant 0 : index
    %159 = vector.load %arg4[%158, %c0_40, %c0_41] : memref<8x16x32xbf16, #tpu.memory_space<vmem>>, vector<1x16x32xbf16>
    %160 = vector.shape_cast %159 : vector<1x16x32xbf16> to vector<16x32xbf16>
    %161 = vector.shape_cast %157 : vector<16x32xbf16> to vector<1x16x32xbf16>
    tpu.vector_store %arg4[%158, %c0_40, %c0_41], %161 {strides = array<i32>} : memref<8x16x32xbf16, #tpu.memory_space<vmem>>, vector<1x16x32xbf16>,
    %c6_i32 = arith.constant 6 : i32
    %162 = arith.index_cast %c6_i32 : i32 to index
    %c0_42 = arith.constant 0 : index
    %c0_43 = arith.constant 0 : index
    %163 = vector.load %arg2[%162, %c0_42, %c0_43] : memref<8x16x128xbf16, #tpu.memory_space<vmem>>, vector<1x16x128xbf16>
    %164 = vector.shape_cast %163 : vector<1x16x128xbf16> to vector<16x128xbf16>
    %165 = arith.extf %164 : vector<16x128xbf16> to vector<16x128xf32>
    %cst_44 = arith.constant dense<0.000000e+00> : vector<16x128xf32>
    %166 = tpu.matmul %156, %3, %cst_44 {dimension_numbers = #tpu.dot_dimension_numbers<[1], [0], [0], [1], [0, 0, 1, 1], [], []>} : vector<16x32xf32>, vector<32x128xf32>, vector<16x128xf32> -> vector<16x128xf32>
    %167 = arith.addf %165, %166 : vector<16x128xf32>
    %168 = arith.negf %167 : vector<16x128xf32>
    %169 = math.exp %168 : vector<16x128xf32>
    %cst_45 = arith.constant 1.000000e+00 : f32
    %170 = vector.broadcast %cst_45 : f32 to vector<16x128xf32>
    %171 = arith.addf %170, %169 : vector<16x128xf32>
    %172 = arith.divf %170, %171 : vector<16x128xf32>
    %173 = math.tanh %167 : vector<16x128xf32>
    %174 = vector.extract_strided_slice %172 {offsets = [0, 0], sizes = [16, 32], strides = [1, 1]} : vector<16x128xf32> to vector<16x32xf32>
    %175 = vector.extract_strided_slice %172 {offsets = [0, 32], sizes = [16, 32], strides = [1, 1]} : vector<16x128xf32> to vector<16x32xf32>
    %176 = vector.extract_strided_slice %173 {offsets = [0, 64], sizes = [16, 32], strides = [1, 1]} : vector<16x128xf32> to vector<16x32xf32>
    %177 = vector.extract_strided_slice %172 {offsets = [0, 96], sizes = [16, 32], strides = [1, 1]} : vector<16x128xf32> to vector<16x32xf32>
    %178 = arith.mulf %175, %154 : vector<16x32xf32>
    %179 = arith.mulf %174, %176 : vector<16x32xf32>
    %180 = arith.addf %178, %179 : vector<16x32xf32>
    %181 = math.tanh %180 : vector<16x32xf32>
    %182 = arith.mulf %177, %181 : vector<16x32xf32>
    %183 = arith.truncf %182 : vector<16x32xf32> to vector<16x32xbf16>
    %184 = arith.index_cast %c6_i32 : i32 to index
    %c0_46 = arith.constant 0 : index
    %c0_47 = arith.constant 0 : index
    %185 = vector.load %arg4[%184, %c0_46, %c0_47] : memref<8x16x32xbf16, #tpu.memory_space<vmem>>, vector<1x16x32xbf16>
    %186 = vector.shape_cast %185 : vector<1x16x32xbf16> to vector<16x32xbf16>
    %187 = vector.shape_cast %183 : vector<16x32xbf16> to vector<1x16x32xbf16>
    tpu.vector_store %arg4[%184, %c0_46, %c0_47], %187 {strides = array<i32>} : memref<8x16x32xbf16, #tpu.memory_space<vmem>>, vector<1x16x32xbf16>,
    %c7_i32 = arith.constant 7 : i32
    %188 = arith.index_cast %c7_i32 : i32 to index
    %c0_48 = arith.constant 0 : index
    %c0_49 = arith.constant 0 : index
    %189 = vector.load %arg2[%188, %c0_48, %c0_49] : memref<8x16x128xbf16, #tpu.memory_space<vmem>>, vector<1x16x128xbf16>
    %190 = vector.shape_cast %189 : vector<1x16x128xbf16> to vector<16x128xbf16>
    %191 = arith.extf %190 : vector<16x128xbf16> to vector<16x128xf32>
    %cst_50 = arith.constant dense<0.000000e+00> : vector<16x128xf32>
    %192 = tpu.matmul %182, %3, %cst_50 {dimension_numbers = #tpu.dot_dimension_numbers<[1], [0], [0], [1], [0, 0, 1, 1], [], []>} : vector<16x32xf32>, vector<32x128xf32>, vector<16x128xf32> -> vector<16x128xf32>
    %193 = arith.addf %191, %192 : vector<16x128xf32>
    %194 = arith.negf %193 : vector<16x128xf32>
    %195 = math.exp %194 : vector<16x128xf32>
    %cst_51 = arith.constant 1.000000e+00 : f32
    %196 = vector.broadcast %cst_51 : f32 to vector<16x128xf32>
    %197 = arith.addf %196, %195 : vector<16x128xf32>
    %198 = arith.divf %196, %197 : vector<16x128xf32>
    %199 = math.tanh %193 : vector<16x128xf32>
    %200 = vector.extract_strided_slice %198 {offsets = [0, 0], sizes = [16, 32], strides = [1, 1]} : vector<16x128xf32> to vector<16x32xf32>
    %201 = vector.extract_strided_slice %198 {offsets = [0, 32], sizes = [16, 32], strides = [1, 1]} : vector<16x128xf32> to vector<16x32xf32>
    %202 = vector.extract_strided_slice %199 {offsets = [0, 64], sizes = [16, 32], strides = [1, 1]} : vector<16x128xf32> to vector<16x32xf32>
    %203 = vector.extract_strided_slice %198 {offsets = [0, 96], sizes = [16, 32], strides = [1, 1]} : vector<16x128xf32> to vector<16x32xf32>
    %204 = arith.mulf %201, %180 : vector<16x32xf32>
    %205 = arith.mulf %200, %202 : vector<16x32xf32>
    %206 = arith.addf %204, %205 : vector<16x32xf32>
    %207 = math.tanh %206 : vector<16x32xf32>
    %208 = arith.mulf %203, %207 : vector<16x32xf32>
    %209 = arith.truncf %208 : vector<16x32xf32> to vector<16x32xbf16>
    %210 = arith.index_cast %c7_i32 : i32 to index
    %c0_52 = arith.constant 0 : index
    %c0_53 = arith.constant 0 : index
    %211 = vector.load %arg4[%210, %c0_52, %c0_53] : memref<8x16x32xbf16, #tpu.memory_space<vmem>>, vector<1x16x32xbf16>
    %212 = vector.shape_cast %211 : vector<1x16x32xbf16> to vector<16x32xbf16>
    %213 = vector.shape_cast %209 : vector<16x32xbf16> to vector<1x16x32xbf16>
    tpu.vector_store %arg4[%210, %c0_52, %c0_53], %213 {strides = array<i32>} : memref<8x16x32xbf16, #tpu.memory_space<vmem>>, vector<1x16x32xbf16>,
    %c8_i32 = arith.constant 8 : i32
    %c0_54 = arith.constant 0 : index
    %c0_55 = arith.constant 0 : index
    %214 = vector.load %arg5[%c0_54, %c0_55] : memref<16x32xf32, #tpu.memory_space<vmem>>, vector<16x32xf32>
    tpu.vector_store %arg5[%c0_54, %c0_55], %208 {strides = array<i32>} : memref<16x32xf32, #tpu.memory_space<vmem>>, vector<16x32xf32>,
    %c0_56 = arith.constant 0 : index
    %c0_57 = arith.constant 0 : index
    %215 = vector.load %arg6[%c0_56, %c0_57] : memref<16x32xf32, #tpu.memory_space<vmem>>, vector<16x32xf32>
    tpu.vector_store %arg6[%c0_56, %c0_57], %206 {strides = array<i32>} : memref<16x32xf32, #tpu.memory_space<vmem>>, vector<16x32xf32>,
    return
  }
  func.func @transform_0(%arg0: i32, %arg1: i32) -> (i32, i32, i32) {
    %c0_i32 = arith.constant 0 : i32
    %c0_i32_0 = arith.constant 0 : i32
    return %arg1, %arg0, %c0_i32 : i32, i32, i32
  }
  func.func @transform_1(%arg0: i32, %arg1: i32) -> (i32, i32) {
    %c0_i32 = arith.constant 0 : i32
    %c0_i32_0 = arith.constant 0 : i32
    %c0_i32_1 = arith.constant 0 : i32
    return %c0_i32, %c0_i32_0 : i32, i32
  }
  func.func @transform_2(%arg0: i32, %arg1: i32) -> (i32, i32, i32) {
    %c0_i32 = arith.constant 0 : i32
    %c0_i32_0 = arith.constant 0 : i32
    return %arg1, %arg0, %c0_i32 : i32, i32, i32
  }
}

</mosaic_0001>

<bundles_post_ra>
// kernel: lstm_dynamics_forward.2
= control target key start
LH: loop header
LB: loop body
LE: loop exit
PB: predicated region body
PF: predicated region fallthrough
CT: control target
= control target key end

     0   :  { %vm15_vm0 = vcmask 261120   ;;  %v1655_v3 = vmov 0.0   ;;  %s1657_s19 = smov 64   ;;  %s1658_s9 = smov 96   ;;  %s1942_s1 = inlined_call_operand.vmem [shape: f32[32,128], index: 1, kind: input, shape index: {}]   ;;  %s1943_s0 = inlined_call_operand.vmem [shape: bf16[8,16,128], index: 0, kind: input, shape index: {}]   ;;  %s1944_s2 = inlined_call_operand.vmem [shape: bf16[8,16,32], index: 2, kind: output, shape index: {}]  }
   0x1   :  { %v20_v0 = vld [vmem:[%s1942_s1] sm:$0xff]  ;;  %v21_v1 = vld [vmem:[%s1942_s1 + $0x8] sm:$0xff]  ;;  %v22_v2 = vld [vmem:[%s1942_s1 + $0x10] sm:$0xff]  ;;  %16 = vst.msk [vmem:[#allocation2] sm:$0xff] %vm15_vm0, %v1655_v3 }
   0x2   :  { %17 = vst.msk [vmem:[#allocation2 + $0x8] sm:$0xff] %vm15_vm0, %v1655_v3  ;;  %18 = vst.msk [vmem:[#allocation3] sm:$0xff] %vm15_vm0, %v1655_v3  ;;  %v1687_v4 = vpack.c.bf16 %v21_v1, %v20_v0  ;;  %v23_v5 = vld [vmem:[%s1942_s1 + $0x18] sm:$0xff]  ;;  %s1656_s1 = smov 32   ;;  %v1285_v11 = vld [vmem:[%s1943_s0] sm:$0xff]  }
   0x3   :  { %19 = vst.msk [vmem:[#allocation3 + $0x8] sm:$0xff] %vm15_vm0, %v1655_v3  ;;  %v1692_v6 = vpack.c.bf16 %v23_v5, %v22_v2  ;;  %v1286_v12 = vunpack.c.l.bf16 %v1285_v11  ;;  %v1287_v13 = vunpack.c.h.bf16 %v1285_v11  ;;  %v1316_v49 = vld [vmem:[%s1943_s0 + $0x8] sm:$0xff]  }
   0x4   :  { %1460 = vmatprep.subr.bf16.mxu0 %v1687_v4  ;;  %1468 = vmatprep.subr.bf16.mxu1 %v1687_v4  ;;  %v1291_v50 = vunpack.c.h.bf16 %v1316_v49  ;;  %v1290_v51 = vunpack.c.l.bf16 %v1316_v49 }
   0x5   :  { %1462 = vmatpush3.bf16.msra.mxu0 %v1687_v4  ;;  %1470 = vmatpush3.bf16.msra.mxu1 %v1687_v4 }
   0x6   :  { %1464 = vmatprep.subr.bf16.mxu0 %v1692_v6  ;;  %1472 = vmatprep.subr.bf16.mxu1 %v1692_v6 }
   0x8   :  { %v24_v7 = vld [vmem:[#allocation2] sm:$0xff] }
   0x9   :  { %v26_v8 = vld [vmem:[#allocation3] sm:$0xff]  ;;  %1466 = vmatpush3.bf16.msra.mxu0 %v1692_v6  ;;  %1379 = vmatprep.mubr.msk.f32.mxu0 %vm15_vm0, %v24_v7  ;;  %v25_v9 = vld [vmem:[#allocation2 + $0x8] sm:$0xff] }
   0xa   :  { %132 = vrot.lane.b32.xlu1 %v26_v8, %s1656_s1  ;;  %1474 = vmatpush3.bf16.msra.mxu1 %v1692_v6  ;;  %v27_v10 = vld [vmem:[#allocation3 + $0x8] sm:$0xff] }
   0xb   :  { %1476 = vmatprep.subr.bf16.mxu0 %v1687_v4  ;;  %1484 = vmatprep.subr.bf16.mxu1 %v1687_v4 }
   0xc   :  { %1380 = vmatmul.mubr.msk.f32.vlgmr.msra.gmra.mrb[0].mxu0 %vm15_vm0, %v25_v9 }
   0xd   :  { %1478 = vmatpush3.bf16.msra.mxu0 %v1687_v4 }
   0xe   :  { %134 = vrot.lane.b32.xlu1 %v27_v10, %s1656_s1  ;;  %1480 = vmatprep.subr.bf16.mxu0 %v1692_v6 }
  0x11   :  { %1482 = vmatpush3.bf16.msra.mxu0 %v1692_v6 }
  0x12   :  { %1492 = vmatprep.subr.bf16.mxu0 %v1687_v4 }
  0x7c   :  { %v133_v32 = vpop.permute.xlu1 %132 }
  0x80   :  { %v135_v34 = vpop.permute.xlu1 %134 }
  0xdf   :  { %v1381_v14 = vpop.f32.mrb[0].mxu0 }
  0xe0   :  { %v105_v15 = vpop.f32.mrb[1].mxu0  ;;  %v115_v17 = vadd.f32 %v1381_v14, %v1287_v13 }
  0xe1   :  { %v114_v16 = vadd.f32 %v1286_v12, %v105_v15 }
  0xe2   :  { %v1234_v21 = vmul.f32 -1.442695, %v115_v17 }
  0xe3   :  { %1527 = vtanh.f32 %v114_v16  ;;  %v1233_v20 = vmul.f32 -1.442695, %v114_v16 }
  0xe4   :  { %1529 = vtanh.f32 %v115_v17 }
  0xe5   :  { %1531 = vpow2.f32 %v1233_v20 }
  0xe6   :  { %1533 = vpow2.f32 %v1234_v21 }
  0xed   :  { %v1528_v18 = vpop.eup %1527 }
  0xee   :  { %142 = vrot.lane.b32.xlu0 %v1528_v18, %s1657_s19  ;;  %v1530_v19 = vpop.eup %1529 }
  0xef   :  { %v1532_v22 = vpop.eup %1531 }
  0xf0   :  { %v122_v23 = vadd.f32 1.0, %v1532_v22  ;;  %v1534_v24 = vpop.eup %1533 }
  0xf1   :  { %v123_v25 = vadd.f32 1.0, %v1534_v24 }
  0xf2   :  { %144 = vrot.lane.b32.xlu0 %v1530_v19, %s1657_s19  ;;  %1535 = vrcp.f32 %v122_v23  ;;  %v1317_v23 = vld [vmem:[%s1943_s0 + $0x10] sm:$0xff]  }
  0xf3   :  { %1537 = vrcp.f32 %v123_v25  ;;  %v1295_v24 = vunpack.c.h.bf16 %v1317_v23  ;;  %v1294_v25 = vunpack.c.l.bf16 %v1317_v23 }
  0xfc   :  { %v1536_v26 = vpop.eup %1535 }
  0xfd   :  { %v1538_v29 = vpop.eup %1537  ;;  %v138_v33 = vmul.f32 %v1536_v26, %v133_v32 }
  0xfe   :  { %v139_v37 = vmul.f32 %v1538_v29, %v135_v34 }
 0x160   :  { %v143_v27 = vpop.permute.xlu0 %142 }
 0x161   :  { %v148_v28 = vmul.f32 %v1536_v26, %v143_v27 }
 0x163   :  { %152 = vrot.lane.b32.xlu0 %v148_v28, %s1656_s1 }
 0x164   :  { %v145_v30 = vpop.permute.xlu0 %144 }
 0x165   :  { %v149_v31 = vmul.f32 %v1538_v29, %v145_v30 }
 0x167   :  { %154 = vrot.lane.b32.xlu1 %v149_v31, %s1656_s1 }
 0x1d5   :  { %v153_v35 = vpop.permute.xlu0 %152 }
 0x1d6   :  { %v158_v36 = vadd.f32 %v153_v35, %v138_v33 }
 0x1d8   :  { %1539 = vtanh.f32 %v158_v36 }
 0x1d9   :  { %v155_v38 = vpop.permute.xlu1 %154 }
 0x1da   :  { %v159_v39 = vadd.f32 %v155_v38, %v139_v37 }
 0x1dc   :  { %1541 = vtanh.f32 %v159_v39 }
 0x1e2   :  { %v1540_v40 = vpop.eup %1539 }
 0x1e3   :  { %164 = vrot.lane.b32.xlu0 %v1540_v40, %s1657_s19 }
 0x1e6   :  { %v1542_v41 = vpop.eup %1541 }
 0x1e7   :  { %166 = vrot.lane.b32.xlu1 %v1542_v41, %s1657_s19 }
 0x255   :  { %v165_v42 = vpop.permute.xlu0 %164 }
 0x256   :  { %v1721_v43 = vmul.f32 %v1536_v26, %v165_v42 }
 0x258   :  { %185 = vrot.lane.b32.xlu0 %v1721_v43, %s1656_s1 }
 0x259   :  { %v167_v44 = vpop.permute.xlu1 %166 }
 0x25a   :  { %v1725_v45 = vmul.f32 %v1538_v29, %v167_v44 }
 0x25c   :  { %v172_v46 = vpack.c.bf16 %v1725_v45, %v1721_v43  ;;  %187 = vrot.lane.b32.xlu1 %v1725_v45, %s1656_s1 }
 0x2ca   :  { %v186_v47 = vpop.permute.xlu0 %185 }
 0x2cb   :  { %1390 = vmatprep.mubr.msk.f32.mxu1 %vm15_vm0, %v186_v47 }
 0x2ce   :  { %v188_v48 = vpop.permute.xlu1 %187 }
 0x2cf   :  { %1391 = vmatmul.mubr.msk.f32.vlgmr.msra.gmra.mrb[0].mxu1 %vm15_vm0, %v188_v48 }
 0x2d0   :  { %1486 = vmatpush3.bf16.msra.mxu1 %v1687_v4 }
 0x2d1   :  { %1488 = vmatprep.subr.bf16.mxu1 %v1692_v6 }
 0x2d4   :  { %1490 = vmatpush3.bf16.msra.mxu1 %v1692_v6 }
 0x2d5   :  { %1500 = vmatprep.subr.bf16.mxu1 %v1687_v4 }
 0x3a2   :  { %v1392_v52 = vpop.f32.mrb[0].mxu1 }
 0x3a3   :  { %v269_v53 = vadd.f32 %v1392_v52, %v1291_v50  ;;  %v259_v54 = vpop.f32.mrb[1].mxu1 }
 0x3a4   :  { %v268_v55 = vadd.f32 %v1290_v51, %v259_v54 }
 0x3a5   :  { %1543 = vtanh.f32 %v269_v53  ;;  %v1240_v58 = vmul.f32 -1.442695, %v269_v53 }
 0x3a6   :  { %1545 = vtanh.f32 %v268_v55  ;;  %v1239_v59 = vmul.f32 -1.442695, %v268_v55 }
 0x3a7   :  { %1547 = vpow2.f32 %v1240_v58 }
 0x3a8   :  { %1549 = vpow2.f32 %v1239_v59 }
 0x3af   :  { %v1544_v56 = vpop.eup %1543 }
 0x3b0   :  { %v1546_v57 = vpop.eup %1545  ;;  %290 = vrot.lane.b32.xlu1 %v1544_v56, %s1657_s19 }
 0x3b1   :  { %288 = vrot.lane.b32.xlu0 %v1546_v57, %s1657_s19  ;;  %v1548_v60 = vpop.eup %1547 }
 0x3b2   :  { %v1550_v61 = vpop.eup %1549  ;;  %v277_v62 = vadd.f32 1.0, %v1548_v60 }
 0x3b3   :  { %v276_v63 = vadd.f32 1.0, %v1550_v61 }
 0x3b4   :  { %1551 = vrcp.f32 %v277_v62  ;;  %v1318_v62 = vld [vmem:[%s1943_s0 + $0x18] sm:$0xff]  }
 0x3b5   :  { %1553 = vrcp.f32 %v276_v63  ;;  %v1299_v63 = vunpack.c.h.bf16 %v1318_v62 }
 0x3be   :  { %v1552_v0 = vpop.eup %1551 }
 0x3bf   :  { %v1554_v2 = vpop.eup %1553  ;;  %v285_v8 = vmul.f32 %v1552_v0, %v159_v39 }
 0x3c0   :  { %v284_v10 = vmul.f32 %v1554_v2, %v158_v36 }
 0x422   :  { %v291_v1 = vpop.permute.xlu1 %290 }
 0x423   :  { %v295_v3 = vmul.f32 %v1552_v0, %v291_v1  ;;  %v289_v5 = vpop.permute.xlu0 %288 }
 0x424   :  { %v294_v7 = vmul.f32 %v1554_v2, %v289_v5 }
 0x425   :  { %300 = vrot.lane.b32.xlu1 %v295_v3, %s1656_s1 }
 0x426   :  { %298 = vrot.lane.b32.xlu0 %v294_v7, %s1656_s1 }
 0x497   :  { %v301_v9 = vpop.permute.xlu1 %300 }
 0x498   :  { %v305_v11 = vadd.f32 %v301_v9, %v285_v8  ;;  %v299_v12 = vpop.permute.xlu0 %298 }
 0x499   :  { %v304_v13 = vadd.f32 %v299_v12, %v284_v10 }
 0x49a   :  { %1555 = vtanh.f32 %v305_v11 }
 0x49b   :  { %1557 = vtanh.f32 %v304_v13 }
 0x4a4   :  { %v1556_v14 = vpop.eup %1555 }
 0x4a5   :  { %v1558_v15 = vpop.eup %1557  ;;  %312 = vrot.lane.b32.xlu1 %v1556_v14, %s1657_s19 }
 0x4a6   :  { %310 = vrot.lane.b32.xlu0 %v1558_v15, %s1657_s19 }
 0x517   :  { %v313_v16 = vpop.permute.xlu1 %312 }
 0x518   :  { %v1746_v17 = vmul.f32 %v1552_v0, %v313_v16  ;;  %v311_v18 = vpop.permute.xlu0 %310  ;;  %v1298_v0 = vunpack.c.l.bf16 %v1318_v62 }
 0x519   :  { %v1748_v19 = vmul.f32 %v1554_v2, %v311_v18 }
 0x51a   :  { %334 = vrot.lane.b32.xlu1 %v1746_v17, %s1656_s1 }
 0x51b   :  { %v318_v20 = vpack.c.bf16 %v1746_v17, %v1748_v19  ;;  %332 = vrot.lane.b32.xlu0 %v1748_v19, %s1656_s1 }
 0x58c   :  { %v335_v22 = vpop.permute.xlu1 %334 }
 0x58d   :  { %v333_v21 = vpop.permute.xlu0 %332 }
 0x58e   :  { %1401 = vmatprep.mubr.msk.f32.mxu0 %vm15_vm0, %v333_v21 }
 0x58f   :  { %1402 = vmatmul.mubr.msk.f32.vlgmr.msra.gmra.mrb[2].mxu0 %vm15_vm0, %v335_v22 }
 0x590   :  { %1494 = vmatpush3.bf16.msra.mxu0 %v1687_v4 }
 0x591   :  { %1496 = vmatprep.subr.bf16.mxu0 %v1692_v6 }
 0x594   :  { %1498 = vmatpush3.bf16.msra.mxu0 %v1692_v6 }
 0x595   :  { %1508 = vmatprep.subr.bf16.mxu0 %v1687_v4 }
 0x662   :  { %v1403_v26 = vpop.f32.mrb[2].mxu0 }
 0x663   :  { %v416_v27 = vadd.f32 %v1403_v26, %v1295_v24  ;;  %v406_v28 = vpop.f32.mrb[3].mxu0 }
 0x664   :  { %v415_v29 = vadd.f32 %v1294_v25, %v406_v28 }
 0x665   :  { %1559 = vtanh.f32 %v416_v27  ;;  %v1247_v32 = vmul.f32 -1.442695, %v416_v27 }
 0x666   :  { %1561 = vtanh.f32 %v415_v29  ;;  %v1246_v33 = vmul.f32 -1.442695, %v415_v29 }
 0x667   :  { %1563 = vpow2.f32 %v1247_v32 }
 0x668   :  { %1565 = vpow2.f32 %v1246_v33 }
 0x66f   :  { %v1560_v30 = vpop.eup %1559 }
 0x670   :  { %v1562_v31 = vpop.eup %1561  ;;  %437 = vrot.lane.b32.xlu1 %v1560_v30, %s1657_s19 }
 0x671   :  { %435 = vrot.lane.b32.xlu0 %v1562_v31, %s1657_s19  ;;  %v1564_v34 = vpop.eup %1563 }
 0x672   :  { %v1566_v35 = vpop.eup %1565  ;;  %v424_v36 = vadd.f32 1.0, %v1564_v34 }
 0x673   :  { %v423_v37 = vadd.f32 1.0, %v1566_v35 }
 0x674   :  { %1567 = vrcp.f32 %v424_v36 }
 0x675   :  { %1569 = vrcp.f32 %v423_v37 }
 0x67e   :  { %v1568_v38 = vpop.eup %1567 }
 0x67f   :  { %v1570_v40 = vpop.eup %1569  ;;  %v432_v47 = vmul.f32 %v1568_v38, %v305_v11 }
 0x680   :  { %v431_v49 = vmul.f32 %v1570_v40, %v304_v13 }
 0x6e2   :  { %v438_v39 = vpop.permute.xlu1 %437 }
 0x6e3   :  { %v442_v41 = vmul.f32 %v1568_v38, %v438_v39  ;;  %v436_v42 = vpop.permute.xlu0 %435  ;;  %v1319_v39 = vld [vmem:[%s1943_s0 + $0x20] sm:$0xff]  }
 0x6e4   :  { %v441_v44 = vmul.f32 %v1570_v40, %v436_v42 }
 0x6e5   :  { %447 = vrot.lane.b32.xlu1 %v442_v41, %s1656_s1  ;;  %v1302_v41 = vunpack.c.l.bf16 %v1319_v39 }
 0x6e6   :  { %445 = vrot.lane.b32.xlu0 %v441_v44, %s1656_s1 }
 0x757   :  { %v448_v48 = vpop.permute.xlu1 %447 }
 0x758   :  { %v452_v50 = vadd.f32 %v448_v48, %v432_v47  ;;  %v446_v51 = vpop.permute.xlu0 %445 }
 0x759   :  { %v451_v52 = vadd.f32 %v446_v51, %v431_v49 }
 0x75a   :  { %1571 = vtanh.f32 %v452_v50 }
 0x75b   :  { %1573 = vtanh.f32 %v451_v52 }
 0x764   :  { %v1572_v53 = vpop.eup %1571 }
 0x765   :  { %v1574_v54 = vpop.eup %1573  ;;  %459 = vrot.lane.b32.xlu1 %v1572_v53, %s1657_s19 }
 0x766   :  { %457 = vrot.lane.b32.xlu0 %v1574_v54, %s1657_s19 }
 0x7d7   :  { %v460_v55 = vpop.permute.xlu1 %459 }
 0x7d8   :  { %v1771_v56 = vmul.f32 %v1568_v38, %v460_v55  ;;  %v458_v57 = vpop.permute.xlu0 %457 }
 0x7d9   :  { %v1773_v58 = vmul.f32 %v1570_v40, %v458_v57  ;;  %v1303_v40 = vunpack.c.h.bf16 %v1319_v39 }
 0x7da   :  { %481 = vrot.lane.b32.xlu1 %v1771_v56, %s1656_s1 }
 0x7db   :  { %v465_v59 = vpack.c.bf16 %v1771_v56, %v1773_v58  ;;  %479 = vrot.lane.b32.xlu0 %v1773_v58, %s1656_s1 }
 0x84c   :  { %v482_v61 = vpop.permute.xlu1 %481 }
 0x84d   :  { %v480_v60 = vpop.permute.xlu0 %479 }
 0x84e   :  { %1412 = vmatprep.mubr.msk.f32.mxu1 %vm15_vm0, %v480_v60 }
 0x84f   :  { %1413 = vmatmul.mubr.msk.f32.vlgmr.msra.gmra.mrb[2].mxu1 %vm15_vm0, %v482_v61 }
 0x850   :  { %1502 = vmatpush3.bf16.msra.mxu1 %v1687_v4 }
 0x851   :  { %1504 = vmatprep.subr.bf16.mxu1 %v1692_v6 }
 0x854   :  { %1506 = vmatpush3.bf16.msra.mxu1 %v1692_v6 }
 0x855   :  { %1516 = vmatprep.subr.bf16.mxu1 %v1687_v4 }
 0x922   :  { %v1414_v1 = vpop.f32.mrb[2].mxu1 }
 0x923   :  { %v563_v2 = vadd.f32 %v1414_v1, %v1299_v63  ;;  %v553_v3 = vpop.f32.mrb[3].mxu1 }
 0x924   :  { %v562_v5 = vadd.f32 %v1298_v0, %v553_v3 }
 0x925   :  { %1575 = vtanh.f32 %v563_v2  ;;  %v1254_v9 = vmul.f32 -1.442695, %v563_v2 }
 0x926   :  { %1577 = vtanh.f32 %v562_v5  ;;  %v1253_v10 = vmul.f32 -1.442695, %v562_v5 }
 0x927   :  { %1579 = vpow2.f32 %v1254_v9 }
 0x928   :  { %1581 = vpow2.f32 %v1253_v10 }
 0x92f   :  { %v1576_v7 = vpop.eup %1575 }
 0x930   :  { %v1578_v8 = vpop.eup %1577  ;;  %584 = vrot.lane.b32.xlu1 %v1576_v7, %s1657_s19 }
 0x931   :  { %582 = vrot.lane.b32.xlu0 %v1578_v8, %s1657_s19  ;;  %v1580_v11 = vpop.eup %1579 }
 0x932   :  { %v1582_v12 = vpop.eup %1581  ;;  %v571_v13 = vadd.f32 1.0, %v1580_v11 }
 0x933   :  { %v570_v14 = vadd.f32 1.0, %v1582_v12 }
 0x934   :  { %1583 = vrcp.f32 %v571_v13 }
 0x935   :  { %1585 = vrcp.f32 %v570_v14 }
 0x93e   :  { %v1584_v15 = vpop.eup %1583 }
 0x93f   :  { %v1586_v18 = vpop.eup %1585  ;;  %v579_v24 = vmul.f32 %v1584_v15, %v452_v50 }
 0x940   :  { %v578_v26 = vmul.f32 %v1586_v18, %v451_v52 }
 0x9a2   :  { %v585_v16 = vpop.permute.xlu1 %584 }
 0x9a3   :  { %v589_v21 = vmul.f32 %v1584_v15, %v585_v16  ;;  %v583_v22 = vpop.permute.xlu0 %582 }
 0x9a4   :  { %v588_v23 = vmul.f32 %v1586_v18, %v583_v22  ;;  %v1320_v22 = vld [vmem:[%s1943_s0 + $0x28] sm:$0xff]  }
 0x9a5   :  { %594 = vrot.lane.b32.xlu1 %v589_v21, %s1656_s1 }
 0x9a6   :  { %592 = vrot.lane.b32.xlu0 %v588_v23, %s1656_s1  ;;  %v1307_v23 = vunpack.c.h.bf16 %v1320_v22 }
 0xa17   :  { %v595_v25 = vpop.permute.xlu1 %594 }
 0xa18   :  { %v599_v27 = vadd.f32 %v595_v25, %v579_v24  ;;  %v593_v28 = vpop.permute.xlu0 %592  ;;  %v1306_v24 = vunpack.c.l.bf16 %v1320_v22 }
 0xa19   :  { %v598_v29 = vadd.f32 %v593_v28, %v578_v26 }
 0xa1a   :  { %1587 = vtanh.f32 %v599_v27 }
 0xa1b   :  { %1589 = vtanh.f32 %v598_v29 }
 0xa24   :  { %v1588_v30 = vpop.eup %1587 }
 0xa25   :  { %v1590_v31 = vpop.eup %1589  ;;  %606 = vrot.lane.b32.xlu1 %v1588_v30, %s1657_s19 }
 0xa26   :  { %604 = vrot.lane.b32.xlu0 %v1590_v31, %s1657_s19 }
 0xa97   :  { %v607_v32 = vpop.permute.xlu1 %606 }
 0xa98   :  { %v1796_v33 = vmul.f32 %v1584_v15, %v607_v32  ;;  %v605_v34 = vpop.permute.xlu0 %604 }
 0xa99   :  { %v1798_v35 = vmul.f32 %v1586_v18, %v605_v34 }
 0xa9a   :  { %628 = vrot.lane.b32.xlu1 %v1796_v33, %s1656_s1 }
 0xa9b   :  { %v612_v36 = vpack.c.bf16 %v1796_v33, %v1798_v35  ;;  %626 = vrot.lane.b32.xlu0 %v1798_v35, %s1656_s1 }
 0xb0c   :  { %v629_v38 = vpop.permute.xlu1 %628 }
 0xb0d   :  { %v627_v37 = vpop.permute.xlu0 %626 }
 0xb0e   :  { %1423 = vmatprep.mubr.msk.f32.mxu0 %vm15_vm0, %v627_v37 }
 0xb0f   :  { %1424 = vmatmul.mubr.msk.f32.vlgmr.msra.gmra.mrb[4].mxu0 %vm15_vm0, %v629_v38 }
 0xb10   :  { %1510 = vmatpush3.bf16.msra.mxu0 %v1687_v4 }
 0xb11   :  { %1512 = vmatprep.subr.bf16.mxu0 %v1692_v6 }
 0xb14   :  { %1514 = vmatpush3.bf16.msra.mxu0 %v1692_v6 }
 0xbe2   :  { %v1425_v42 = vpop.f32.mrb[4].mxu0 }
 0xbe3   :  { %v710_v44 = vadd.f32 %v1425_v42, %v1303_v40  ;;  %v700_v47 = vpop.f32.mrb[5].mxu0 }
 0xbe4   :  { %v709_v48 = vadd.f32 %v1302_v41, %v700_v47 }
 0xbe5   :  { %1591 = vtanh.f32 %v710_v44  ;;  %v1261_v51 = vmul.f32 -1.442695, %v710_v44 }
 0xbe6   :  { %1593 = vtanh.f32 %v709_v48  ;;  %v1260_v52 = vmul.f32 -1.442695, %v709_v48 }
 0xbe7   :  { %1595 = vpow2.f32 %v1261_v51 }
 0xbe8   :  { %1597 = vpow2.f32 %v1260_v52 }
 0xbef   :  { %v1592_v49 = vpop.eup %1591 }
 0xbf0   :  { %v1594_v50 = vpop.eup %1593  ;;  %731 = vrot.lane.b32.xlu1 %v1592_v49, %s1657_s19 }
 0xbf1   :  { %729 = vrot.lane.b32.xlu0 %v1594_v50, %s1657_s19  ;;  %v1596_v53 = vpop.eup %1595 }
 0xbf2   :  { %v1598_v54 = vpop.eup %1597  ;;  %v718_v55 = vadd.f32 1.0, %v1596_v53 }
 0xbf3   :  { %v717_v57 = vadd.f32 1.0, %v1598_v54 }
 0xbf4   :  { %1599 = vrcp.f32 %v718_v55 }
 0xbf5   :  { %1601 = vrcp.f32 %v717_v57 }
 0xbfe   :  { %v1600_v60 = vpop.eup %1599 }
 0xbff   :  { %v1602_v62 = vpop.eup %1601  ;;  %v726_v2 = vmul.f32 %v1600_v60, %v599_v27 }
 0xc00   :  { %v725_v5 = vmul.f32 %v1602_v62, %v598_v29 }
 0xc62   :  { %v732_v61 = vpop.permute.xlu1 %731 }
 0xc63   :  { %v736_v63 = vmul.f32 %v1600_v60, %v732_v61  ;;  %v730_v0 = vpop.permute.xlu0 %729 }
 0xc64   :  { %v735_v1 = vmul.f32 %v1602_v62, %v730_v0 }
 0xc65   :  { %741 = vrot.lane.b32.xlu1 %v736_v63, %s1656_s1 }
 0xc66   :  { %739 = vrot.lane.b32.xlu0 %v735_v1, %s1656_s1  ;;  %v1321_v1 = vld [vmem:[%s1943_s0 + $0x30] sm:$0xff]  }
 0xcd7   :  { %v742_v3 = vpop.permute.xlu1 %741 }
 0xcd8   :  { %v746_v7 = vadd.f32 %v742_v3, %v726_v2  ;;  %v740_v8 = vpop.permute.xlu0 %739  ;;  %v1311_v2 = vunpack.c.h.bf16 %v1321_v1  ;;  %v1310_v3 = vunpack.c.l.bf16 %v1321_v1 }
 0xcd9   :  { %v745_v9 = vadd.f32 %v740_v8, %v725_v5 }
 0xcda   :  { %1603 = vtanh.f32 %v746_v7 }
 0xcdb   :  { %1605 = vtanh.f32 %v745_v9 }
 0xce4   :  { %v1604_v10 = vpop.eup %1603 }
 0xce5   :  { %v1606_v11 = vpop.eup %1605  ;;  %753 = vrot.lane.b32.xlu1 %v1604_v10, %s1657_s19 }
 0xce6   :  { %751 = vrot.lane.b32.xlu0 %v1606_v11, %s1657_s19 }
 0xd57   :  { %v754_v12 = vpop.permute.xlu1 %753 }
 0xd58   :  { %v1820_v13 = vmul.f32 %v1600_v60, %v754_v12  ;;  %v752_v14 = vpop.permute.xlu0 %751 }
 0xd59   :  { %v1822_v15 = vmul.f32 %v1602_v62, %v752_v14 }
 0xd5a   :  { %775 = vrot.lane.b32.xlu1 %v1820_v13, %s1656_s1 }
 0xd5b   :  { %v759_v16 = vpack.c.bf16 %v1820_v13, %v1822_v15  ;;  %773 = vrot.lane.b32.xlu0 %v1822_v15, %s1656_s1 }
 0xdcc   :  { %v776_v21 = vpop.permute.xlu1 %775 }
 0xdcd   :  { %v774_v18 = vpop.permute.xlu0 %773 }
 0xdce   :  { %1434 = vmatprep.mubr.msk.f32.mxu1 %vm15_vm0, %v774_v18 }
 0xdcf   :  { %1435 = vmatmul.mubr.msk.f32.vlgmr.msra.gmra.mrb[4].mxu1 %vm15_vm0, %v776_v21 }
 0xdd0   :  { %1518 = vmatpush3.bf16.msra.mxu1 %v1687_v4 }
 0xdd1   :  { %1520 = vmatprep.subr.bf16.mxu1 %v1692_v6 }
 0xdd4   :  { %1522 = vmatpush3.bf16.msra.mxu1 %v1692_v6 }
 0xea2   :  { %v1436_v25 = vpop.f32.mrb[4].mxu1 }
 0xea3   :  { %v857_v26 = vadd.f32 %v1436_v25, %v1307_v23  ;;  %v847_v27 = vpop.f32.mrb[5].mxu1 }
 0xea4   :  { %v856_v28 = vadd.f32 %v1306_v24, %v847_v27 }
 0xea5   :  { %1607 = vtanh.f32 %v857_v26  ;;  %v1268_v4 = vmul.f32 -1.442695, %v857_v26 }
 0xea6   :  { %1609 = vtanh.f32 %v856_v28  ;;  %v1267_v6 = vmul.f32 -1.442695, %v856_v28 }
 0xea7   :  { %1611 = vpow2.f32 %v1268_v4 }
 0xea8   :  { %1613 = vpow2.f32 %v1267_v6 }
 0xeaf   :  { %v1608_v29 = vpop.eup %1607 }
 0xeb0   :  { %v1610_v30 = vpop.eup %1609  ;;  %878 = vrot.lane.b32.xlu1 %v1608_v29, %s1657_s19 }
 0xeb1   :  { %876 = vrot.lane.b32.xlu0 %v1610_v30, %s1657_s19  ;;  %v1612_v31 = vpop.eup %1611 }
 0xeb2   :  { %v1614_v32 = vpop.eup %1613  ;;  %v865_v34 = vadd.f32 1.0, %v1612_v31 }
 0xeb3   :  { %v864_v37 = vadd.f32 1.0, %v1614_v32 }
 0xeb4   :  { %1615 = vrcp.f32 %v865_v34 }
 0xeb5   :  { %1617 = vrcp.f32 %v864_v37 }
 0xebe   :  { %v1616_v38 = vpop.eup %1615 }
 0xebf   :  { %v1618_v40 = vpop.eup %1617  ;;  %v873_v47 = vmul.f32 %v1616_v38, %v746_v7 }
 0xec0   :  { %v872_v49 = vmul.f32 %v1618_v40, %v745_v9 }
 0xf22   :  { %v879_v39 = vpop.permute.xlu1 %878 }
 0xf23   :  { %v883_v41 = vmul.f32 %v1616_v38, %v879_v39  ;;  %v877_v42 = vpop.permute.xlu0 %876 }
 0xf24   :  { %v882_v44 = vmul.f32 %v1618_v40, %v877_v42 }
 0xf25   :  { %888 = vrot.lane.b32.xlu1 %v883_v41, %s1656_s1 }
 0xf26   :  { %886 = vrot.lane.b32.xlu0 %v882_v44, %s1656_s1 }
 0xf97   :  { %v889_v48 = vpop.permute.xlu1 %888 }
 0xf98   :  { %v893_v50 = vadd.f32 %v889_v48, %v873_v47  ;;  %v887_v51 = vpop.permute.xlu0 %886 }
 0xf99   :  { %v892_v52 = vadd.f32 %v887_v51, %v872_v49  ;;  %v1322_v49 = vld [vmem:[%s1943_s0 + $0x38] sm:$0xff]  }
 0xf9a   :  { %1619 = vtanh.f32 %v893_v50  ;;  %v1314_v51 = vunpack.c.l.bf16 %v1322_v49 }
 0xf9b   :  { %1621 = vtanh.f32 %v892_v52 }
 0xfa4   :  { %v1620_v53 = vpop.eup %1619 }
 0xfa5   :  { %v1622_v54 = vpop.eup %1621  ;;  %900 = vrot.lane.b32.xlu1 %v1620_v53, %s1657_s19 }
 0xfa6   :  { %898 = vrot.lane.b32.xlu0 %v1622_v54, %s1657_s19 }
0x1017   :  { %v901_v55 = vpop.permute.xlu1 %900 }
0x1018   :  { %v1844_v57 = vmul.f32 %v1616_v38, %v901_v55  ;;  %v899_v60 = vpop.permute.xlu0 %898 }
0x1019   :  { %v1846_v61 = vmul.f32 %v1618_v40, %v899_v60 }
0x101a   :  { %922 = vrot.lane.b32.xlu1 %v1844_v57, %s1656_s1 }
0x101b   :  { %v906_v62 = vpack.c.bf16 %v1844_v57, %v1846_v61  ;;  %920 = vrot.lane.b32.xlu0 %v1846_v61, %s1656_s1 }
0x108c   :  { %v923_v0 = vpop.permute.xlu1 %922 }
0x108d   :  { %v921_v63 = vpop.permute.xlu0 %920 }
0x108e   :  { %1445 = vmatprep.mubr.msk.f32.mxu0 %vm15_vm0, %v921_v63 }
0x108f   :  { %1446 = vmatmul.mubr.msk.f32.vlgmr.msra.gmra.mrb[6].mxu0 %vm15_vm0, %v923_v0 }
0x1162   :  { %v1447_v5 = vpop.f32.mrb[6].mxu0 }
0x1163   :  { %v1004_v7 = vadd.f32 %v1447_v5, %v1311_v2  ;;  %v994_v8 = vpop.f32.mrb[7].mxu0 }
0x1164   :  { %v1003_v9 = vadd.f32 %v1310_v3, %v994_v8 }
0x1165   :  { %1623 = vtanh.f32 %v1004_v7  ;;  %v1275_v12 = vmul.f32 -1.442695, %v1004_v7 }
0x1166   :  { %1625 = vtanh.f32 %v1003_v9  ;;  %v1274_v14 = vmul.f32 -1.442695, %v1003_v9 }
0x1167   :  { %1627 = vpow2.f32 %v1275_v12 }
0x1168   :  { %1629 = vpow2.f32 %v1274_v14 }
0x116f   :  { %v1624_v10 = vpop.eup %1623 }
0x1170   :  { %v1626_v11 = vpop.eup %1625  ;;  %1025 = vrot.lane.b32.xlu1 %v1624_v10, %s1657_s19 }
0x1171   :  { %1023 = vrot.lane.b32.xlu0 %v1626_v11, %s1657_s19  ;;  %v1628_v18 = vpop.eup %1627 }
0x1172   :  { %v1630_v21 = vpop.eup %1629  ;;  %v1012_v22 = vadd.f32 1.0, %v1628_v18 }
0x1173   :  { %v1011_v23 = vadd.f32 1.0, %v1630_v21 }
0x1174   :  { %1631 = vrcp.f32 %v1012_v22 }
0x1175   :  { %1633 = vrcp.f32 %v1011_v23 }
0x117e   :  { %v1632_v24 = vpop.eup %1631 }
0x117f   :  { %v1634_v26 = vpop.eup %1633  ;;  %v1020_v30 = vmul.f32 %v1632_v24, %v893_v50  ;;  %v1315_v50 = vunpack.c.h.bf16 %v1322_v49 }
0x1180   :  { %v1019_v6 = vmul.f32 %v1634_v26, %v892_v52 }
0x11e2   :  { %v1026_v25 = vpop.permute.xlu1 %1025 }
0x11e3   :  { %v1030_v27 = vmul.f32 %v1632_v24, %v1026_v25  ;;  %v1024_v28 = vpop.permute.xlu0 %1023 }
0x11e4   :  { %v1029_v29 = vmul.f32 %v1634_v26, %v1024_v28 }
0x11e5   :  { %1035 = vrot.lane.b32.xlu1 %v1030_v27, %s1656_s1 }
0x11e6   :  { %1033 = vrot.lane.b32.xlu0 %v1029_v29, %s1656_s1 }
0x1257   :  { %v1036_v4 = vpop.permute.xlu1 %1035 }
0x1258   :  { %v1040_v31 = vadd.f32 %v1036_v4, %v1020_v30  ;;  %v1034_v32 = vpop.permute.xlu0 %1033 }
0x1259   :  { %v1039_v34 = vadd.f32 %v1034_v32, %v1019_v6 }
0x125a   :  { %1635 = vtanh.f32 %v1040_v31 }
0x125b   :  { %1637 = vtanh.f32 %v1039_v34 }
0x1264   :  { %v1636_v37 = vpop.eup %1635 }
0x1265   :  { %v1638_v38 = vpop.eup %1637  ;;  %1047 = vrot.lane.b32.xlu1 %v1636_v37, %s1657_s19 }
0x1266   :  { %1045 = vrot.lane.b32.xlu0 %v1638_v38, %s1657_s19 }
0x12d7   :  { %v1048_v39 = vpop.permute.xlu1 %1047 }
0x12d8   :  { %v1052_v40 = vmul.f32 %v1632_v24, %v1048_v39  ;;  %v1046_v41 = vpop.permute.xlu0 %1045 }
0x12d9   :  { %v1051_v42 = vmul.f32 %v1634_v26, %v1046_v41 }
0x12da   :  { %1069 = vrot.lane.b32.xlu1 %v1052_v40, %s1656_s1 }
0x12db   :  { %v1053_v44 = vpack.c.bf16 %v1052_v40, %v1051_v42  ;;  %1067 = vrot.lane.b32.xlu0 %v1051_v42, %s1656_s1 }
0x134c   :  { %v1070_v48 = vpop.permute.xlu1 %1069 }
0x134d   :  { %v1068_v47 = vpop.permute.xlu0 %1067 }
0x134e   :  { %1456 = vmatprep.mubr.msk.f32.mxu1 %vm15_vm0, %v1068_v47 }
0x134f   :  { %1457 = vmatmul.mubr.msk.f32.vlgmr.msra.gmra.mrb[6].mxu1 %vm15_vm0, %v1070_v48 }
0x1422   :  { %v1458_v52 = vpop.f32.mrb[6].mxu1 }
0x1423   :  { %v1151_v53 = vadd.f32 %v1458_v52, %v1315_v50  ;;  %v1141_v54 = vpop.f32.mrb[7].mxu1 }
0x1424   :  { %v1150_v55 = vadd.f32 %v1314_v51, %v1141_v54 }
0x1425   :  { %1639 = vtanh.f32 %v1151_v53  ;;  %v1282_v0 = vmul.f32 -1.442695, %v1151_v53 }
0x1426   :  { %1641 = vtanh.f32 %v1150_v55  ;;  %v1281_v1 = vmul.f32 -1.442695, %v1150_v55 }
0x1427   :  { %1643 = vpow2.f32 %v1282_v0 }
0x1428   :  { %1645 = vpow2.f32 %v1281_v1 }
0x142f   :  { %v1640_v60 = vpop.eup %1639 }
0x1430   :  { %v1642_v63 = vpop.eup %1641  ;;  %1172 = vrot.lane.b32.xlu1 %v1640_v60, %s1657_s19 }
0x1431   :  { %1170 = vrot.lane.b32.xlu0 %v1642_v63, %s1657_s19  ;;  %v1644_v2 = vpop.eup %1643 }
0x1432   :  { %v1646_v3 = vpop.eup %1645  ;;  %v1159_v5 = vadd.f32 1.0, %v1644_v2 }
0x1433   :  { %v1158_v7 = vadd.f32 1.0, %v1646_v3 }
0x1434   :  { %1647 = vrcp.f32 %v1159_v5 }
0x1435   :  { %1649 = vrcp.f32 %v1158_v7 }
0x143e   :  { %v1648_v8 = vpop.eup %1647 }
0x143f   :  { %v1650_v10 = vpop.eup %1649  ;;  %v1167_v18 = vmul.f32 %v1648_v8, %v1040_v31 }
0x1440   :  { %v1166_v22 = vmul.f32 %v1650_v10, %v1039_v34 }
0x14a2   :  { %v1173_v9 = vpop.permute.xlu1 %1172 }
0x14a3   :  { %v1177_v11 = vmul.f32 %v1648_v8, %v1173_v9  ;;  %v1171_v12 = vpop.permute.xlu0 %1170 }
0x14a4   :  { %v1176_v14 = vmul.f32 %v1650_v10, %v1171_v12 }
0x14a5   :  { %1182 = vrot.lane.b32.xlu1 %v1177_v11, %s1656_s1 }
0x14a6   :  { %1180 = vrot.lane.b32.xlu0 %v1176_v14, %s1656_s1 }
0x1517   :  { %v1183_v21 = vpop.permute.xlu1 %1182 }
0x1518   :  { %v1187_v23 = vadd.f32 %v1183_v21, %v1167_v18  ;;  %v1181_v24 = vpop.permute.xlu0 %1180 }
0x1519   :  { %v1186_v25 = vadd.f32 %v1181_v24, %v1166_v22 }
0x151a   :  { %1651 = vtanh.f32 %v1187_v23 }
0x151b   :  { %1653 = vtanh.f32 %v1186_v25 }
0x1524   :  { %v1652_v26 = vpop.eup %1651 }
0x1525   :  { %v1654_v27 = vpop.eup %1653  ;;  %1194 = vrot.lane.b32.xlu1 %v1652_v26, %s1657_s19 }
0x1526   :  { %1192 = vrot.lane.b32.xlu0 %v1654_v27, %s1657_s19 }
0x1529   :  { %320 = vrot.lane.b32.xlu1 %v318_v20, %s1656_s1 }
0x152a   :  { %174 = vrot.lane.b32.xlu0 %v172_v46, %s1656_s1 }
0x152d   :  { %614 = vrot.lane.b32.xlu1 %v612_v36, %s1656_s1 }
0x152e   :  { %467 = vrot.lane.b32.xlu0 %v465_v59, %s1656_s1 }
0x1531   :  { %908 = vrot.lane.b32.xlu1 %v906_v62, %s1656_s1 }
0x1532   :  { %761 = vrot.lane.b32.xlu0 %v759_v16, %s1656_s1 }
0x1536   :  { %1055 = vrot.lane.b32.xlu0 %v1053_v44, %s1656_s1 }
0x1597   :  { %v1195_v43 = vpop.permute.xlu1 %1194 }
0x1598   :  { %v1199_v45 = vmul.f32 %v1648_v8, %v1195_v43  ;;  %v1193_v46 = vpop.permute.xlu0 %1192 }
0x1599   :  { %v1198_v17 = vmul.f32 %v1650_v10, %v1193_v46 }
0x159a   :  { %1211 = vrot.lane.b32.xlu1 %v1199_v45, %s1656_s1 }
0x159b   :  { %v1200_v19 = vpack.c.bf16 %v1199_v45, %v1198_v17  ;;  %v321_v20 = vpop.permute.xlu1 %320  ;;  %1209 = vrot.lane.b32.xlu0 %v1198_v17, %s1656_s1 }
0x159c   :  { %1241 = vst.msk [vmem:[%s1944_s2 + $0x8] sm:$0xff] %vm15_vm0, %v321_v20  ;;  %v175_v56 = vpop.permute.xlu0 %174 }
0x159d   :  { %177 = vst.msk [vmem:[%s1944_s2] sm:$0xff] %vm15_vm0, %v175_v56 }
0x159e   :  { %1202 = vrot.lane.b32.xlu1 %v1200_v19, %s1656_s1 }
0x159f   :  { %v615_v58 = vpop.permute.xlu1 %614  ;;  %1219 = vrot.lane.b32.xlu0 %v1186_v25, %s1658_s9 }
0x15a0   :  { %1255 = vst.msk [vmem:[%s1944_s2 + $0x18] sm:$0xff] %vm15_vm0, %v615_v58  ;;  %v468_v59 = vpop.permute.xlu0 %467 }
0x15a1   :  { %1248 = vst.msk [vmem:[%s1944_s2 + $0x10] sm:$0xff] %vm15_vm0, %v468_v59 }
0x15a2   :  { %1221 = vrot.lane.b32.xlu1 %v1187_v23, %s1658_s9 }
0x15a3   :  { %v909_v33 = vpop.permute.xlu1 %908 }
0x15a4   :  { %1269 = vst.msk [vmem:[%s1944_s2 + $0x28] sm:$0xff] %vm15_vm0, %v909_v33  ;;  %v762_v35 = vpop.permute.xlu0 %761 }
0x15a5   :  { %1262 = vst.msk [vmem:[%s1944_s2 + $0x20] sm:$0xff] %vm15_vm0, %v762_v35 }
0x15a8   :  { %v1056_v36 = vpop.permute.xlu0 %1055 }
0x15a9   :  { %1276 = vst.msk [vmem:[%s1944_s2 + $0x30] sm:$0xff] %vm15_vm0, %v1056_v36 }
0x160c   :  { %v1212_v13 = vpop.permute.xlu1 %1211 }
0x160d   :  { %1216 = vst.msk [vmem:[#allocation2 + $0x8] sm:$0xff] %vm15_vm0, %v1212_v13  ;;  %v1210_v15 = vpop.permute.xlu0 %1209 }
0x160e   :  { %1215 = vst.msk [vmem:[#allocation2] sm:$0xff] %vm15_vm0, %v1210_v15 }
0x1610   :  { %v1203_v16 = vpop.permute.xlu1 %1202 }
0x1611   :  { %1283 = vst.msk [vmem:[%s1944_s2 + $0x38] sm:$0xff] %vm15_vm0, %v1203_v16  ;;  %v1220_v57 = vpop.permute.xlu0 %1219 }
0x1612   :  { %1225 = vst.msk [vmem:[#allocation3] sm:$0xff] %vm15_vm0, %v1220_v57 }
0x1614   :  { %v1222_v61 = vpop.permute.xlu1 %1221 }
0x1615   :  { %1226 = vst.msk [vmem:[#allocation3 + $0x8] sm:$0xff] %vm15_vm0, %v1222_v61 }

// kernel: lstm_dynamics_forward.3
= control target key start
LH: loop header
LB: loop body
LE: loop exit
PB: predicated region body
PF: predicated region fallthrough
CT: control target
= control target key end

     0   :  { %vm15_vm0 = vcmask 261120   ;;  %v1759_v3 = vmov 0.0   ;;  %s1761_s19 = smov 64   ;;  %vm184_vm1 = vcmask 257024   ;;  %s1762_s13 = smov 96   ;;  %s2090_s1 = inlined_call_operand.vmem [shape: f32[32,128], index: 1, kind: input, shape index: {}]   ;;  %s2091_s0 = inlined_call_operand.vmem [shape: bf16[8,16,128], index: 0, kind: input, shape index: {}]   ;;  %s2092_s2 = inlined_call_operand.vmem [shape: bf16[8,16,32], index: 2, kind: output, shape index: {}]  }
   0x1   :  { %v20_v0 = vld [vmem:[%s2090_s1] sm:$0xff]  ;;  %v21_v1 = vld [vmem:[%s2090_s1 + $0x8] sm:$0xff]  ;;  %v22_v2 = vld [vmem:[%s2090_s1 + $0x10] sm:$0xff]  ;;  %16 = vst.msk [vmem:[#allocation2] sm:$0xff] %vm15_vm0, %v1759_v3 }
   0x2   :  { %17 = vst.msk [vmem:[#allocation2 + $0x8] sm:$0xff] %vm15_vm0, %v1759_v3  ;;  %18 = vst.msk [vmem:[#allocation3] sm:$0xff] %vm15_vm0, %v1759_v3  ;;  %v1791_v4 = vpack.c.bf16 %v21_v1, %v20_v0  ;;  %v23_v5 = vld [vmem:[%s2090_s1 + $0x18] sm:$0xff]  ;;  %s1760_s1 = smov 32   ;;  %v1389_v11 = vld [vmem:[%s2091_s0] sm:$0xff]  }
   0x3   :  { %19 = vst.msk [vmem:[#allocation3 + $0x8] sm:$0xff] %vm15_vm0, %v1759_v3  ;;  %v1796_v6 = vpack.c.bf16 %v23_v5, %v22_v2  ;;  %v1390_v12 = vunpack.c.l.bf16 %v1389_v11  ;;  %v1391_v13 = vunpack.c.h.bf16 %v1389_v11  ;;  %v1420_v48 = vld [vmem:[%s2091_s0 + $0x8] sm:$0xff]  }
   0x4   :  { %1564 = vmatprep.subr.bf16.mxu0 %v1791_v4  ;;  %1572 = vmatprep.subr.bf16.mxu1 %v1791_v4  ;;  %v1395_v49 = vunpack.c.h.bf16 %v1420_v48  ;;  %v1394_v50 = vunpack.c.l.bf16 %v1420_v48 }
   0x5   :  { %1566 = vmatpush3.bf16.msra.mxu0 %v1791_v4  ;;  %1574 = vmatpush3.bf16.msra.mxu1 %v1791_v4 }
   0x6   :  { %1568 = vmatprep.subr.bf16.mxu0 %v1796_v6  ;;  %1576 = vmatprep.subr.bf16.mxu1 %v1796_v6 }
   0x8   :  { %v24_v7 = vld [vmem:[#allocation2] sm:$0xff] }
   0x9   :  { %v26_v8 = vld [vmem:[#allocation3] sm:$0xff]  ;;  %1570 = vmatpush3.bf16.msra.mxu0 %v1796_v6  ;;  %1483 = vmatprep.mubr.msk.f32.mxu0 %vm15_vm0, %v24_v7  ;;  %v25_v9 = vld [vmem:[#allocation2 + $0x8] sm:$0xff] }
   0xa   :  { %132 = vrot.lane.b32.xlu1 %v26_v8, %s1760_s1  ;;  %1578 = vmatpush3.bf16.msra.mxu1 %v1796_v6  ;;  %v27_v10 = vld [vmem:[#allocation3 + $0x8] sm:$0xff] }
   0xb   :  { %1580 = vmatprep.subr.bf16.mxu0 %v1791_v4  ;;  %1588 = vmatprep.subr.bf16.mxu1 %v1791_v4 }
   0xc   :  { %1484 = vmatmul.mubr.msk.f32.vlgmr.msra.gmra.mrb[0].mxu0 %vm15_vm0, %v25_v9 }
   0xd   :  { %1582 = vmatpush3.bf16.msra.mxu0 %v1791_v4 }
   0xe   :  { %134 = vrot.lane.b32.xlu1 %v27_v10, %s1760_s1  ;;  %1584 = vmatprep.subr.bf16.mxu0 %v1796_v6 }
  0x11   :  { %1586 = vmatpush3.bf16.msra.mxu0 %v1796_v6 }
  0x12   :  { %1596 = vmatprep.subr.bf16.mxu0 %v1791_v4 }
  0x7c   :  { %v133_v32 = vpop.permute.xlu1 %132 }
  0x80   :  { %v135_v34 = vpop.permute.xlu1 %134 }
  0xdf   :  { %v1485_v14 = vpop.f32.mrb[0].mxu0 }
  0xe0   :  { %v105_v15 = vpop.f32.mrb[1].mxu0  ;;  %v115_v17 = vadd.f32 %v1485_v14, %v1391_v13 }
  0xe1   :  { %v114_v16 = vadd.f32 %v1390_v12, %v105_v15 }
  0xe2   :  { %v1299_v21 = vmul.f32 -1.442695, %v115_v17 }
  0xe3   :  { %1631 = vtanh.f32 %v114_v16  ;;  %v1298_v20 = vmul.f32 -1.442695, %v114_v16 }
  0xe4   :  { %1633 = vtanh.f32 %v115_v17 }
  0xe5   :  { %1635 = vpow2.f32 %v1298_v20 }
  0xe6   :  { %1637 = vpow2.f32 %v1299_v21  ;;  %v1421_v21 = vld [vmem:[%s2091_s0 + $0x10] sm:$0xff]  }
  0xed   :  { %v1632_v18 = vpop.eup %1631 }
  0xee   :  { %142 = vrot.lane.b32.xlu0 %v1632_v18, %s1761_s19  ;;  %v1634_v19 = vpop.eup %1633 }
  0xef   :  { %v1636_v22 = vpop.eup %1635 }
  0xf0   :  { %v122_v23 = vadd.f32 1.0, %v1636_v22  ;;  %v1638_v24 = vpop.eup %1637  ;;  %v1399_v22 = vunpack.c.h.bf16 %v1421_v21 }
  0xf1   :  { %v123_v25 = vadd.f32 1.0, %v1638_v24 }
  0xf2   :  { %144 = vrot.lane.b32.xlu0 %v1634_v19, %s1761_s19  ;;  %1639 = vrcp.f32 %v122_v23  ;;  %v1398_v23 = vunpack.c.l.bf16 %v1421_v21 }
  0xf3   :  { %1641 = vrcp.f32 %v123_v25 }
  0xfc   :  { %v1640_v26 = vpop.eup %1639 }
  0xfd   :  { %v1642_v29 = vpop.eup %1641  ;;  %v138_v33 = vmul.f32 %v1640_v26, %v133_v32 }
  0xfe   :  { %v139_v37 = vmul.f32 %v1642_v29, %v135_v34 }
 0x160   :  { %v143_v27 = vpop.permute.xlu0 %142 }
 0x161   :  { %v148_v28 = vmul.f32 %v1640_v26, %v143_v27 }
 0x163   :  { %152 = vrot.lane.b32.xlu0 %v148_v28, %s1760_s1 }
 0x164   :  { %v145_v30 = vpop.permute.xlu0 %144 }
 0x165   :  { %v149_v31 = vmul.f32 %v1642_v29, %v145_v30 }
 0x167   :  { %154 = vrot.lane.b32.xlu1 %v149_v31, %s1760_s1 }
 0x1d5   :  { %v153_v35 = vpop.permute.xlu0 %152 }
 0x1d6   :  { %v158_v36 = vadd.f32 %v153_v35, %v138_v33 }
 0x1d8   :  { %1643 = vtanh.f32 %v158_v36 }
 0x1d9   :  { %v155_v38 = vpop.permute.xlu1 %154 }
 0x1da   :  { %v159_v39 = vadd.f32 %v155_v38, %v139_v37 }
 0x1dc   :  { %1645 = vtanh.f32 %v159_v39 }
 0x1e2   :  { %v1644_v40 = vpop.eup %1643 }
 0x1e3   :  { %164 = vrot.lane.b32.xlu0 %v1644_v40, %s1761_s19 }
 0x1e6   :  { %v1646_v41 = vpop.eup %1645 }
 0x1e7   :  { %166 = vrot.lane.b32.xlu1 %v1646_v41, %s1761_s19 }
 0x255   :  { %v165_v42 = vpop.permute.xlu0 %164 }
 0x256   :  { %v1825_v43 = vmul.f32 %v1640_v26, %v165_v42 }
 0x258   :  { %194 = vrot.lane.b32.xlu0 %v1825_v43, %s1760_s1 }
 0x259   :  { %v167_v44 = vpop.permute.xlu1 %166 }
 0x25a   :  { %v1829_v45 = vmul.f32 %v1642_v29, %v167_v44 }
 0x25c   :  { %196 = vrot.lane.b32.xlu1 %v1829_v45, %s1760_s1 }
 0x2ca   :  { %v195_v46 = vpop.permute.xlu0 %194 }
 0x2cb   :  { %1494 = vmatprep.mubr.msk.f32.mxu1 %vm15_vm0, %v195_v46 }
 0x2ce   :  { %v197_v47 = vpop.permute.xlu1 %196 }
 0x2cf   :  { %1495 = vmatmul.mubr.msk.f32.vlgmr.msra.gmra.mrb[0].mxu1 %vm15_vm0, %v197_v47 }
 0x2d0   :  { %1590 = vmatpush3.bf16.msra.mxu1 %v1791_v4 }
 0x2d1   :  { %1592 = vmatprep.subr.bf16.mxu1 %v1796_v6 }
 0x2d4   :  { %1594 = vmatpush3.bf16.msra.mxu1 %v1796_v6 }
 0x2d5   :  { %1604 = vmatprep.subr.bf16.mxu1 %v1791_v4 }
 0x3a2   :  { %v1496_v51 = vpop.f32.mrb[0].mxu1 }
 0x3a3   :  { %v278_v52 = vadd.f32 %v1496_v51, %v1395_v49  ;;  %v268_v53 = vpop.f32.mrb[1].mxu1 }
 0x3a4   :  { %v277_v54 = vadd.f32 %v1394_v50, %v268_v53 }
 0x3a5   :  { %1647 = vtanh.f32 %v278_v52  ;;  %v1307_v57 = vmul.f32 -1.442695, %v278_v52 }
 0x3a6   :  { %1649 = vtanh.f32 %v277_v54  ;;  %v1306_v58 = vmul.f32 -1.442695, %v277_v54 }
 0x3a7   :  { %1651 = vpow2.f32 %v1307_v57 }
 0x3a8   :  { %1653 = vpow2.f32 %v1306_v58  ;;  %v1422_v58 = vld [vmem:[%s2091_s0 + $0x18] sm:$0xff]  }
 0x3af   :  { %v1648_v55 = vpop.eup %1647 }
 0x3b0   :  { %v1650_v56 = vpop.eup %1649  ;;  %299 = vrot.lane.b32.xlu1 %v1648_v55, %s1761_s19 }
 0x3b1   :  { %297 = vrot.lane.b32.xlu0 %v1650_v56, %s1761_s19  ;;  %v1652_v59 = vpop.eup %1651 }
 0x3b2   :  { %v1654_v60 = vpop.eup %1653  ;;  %v286_v61 = vadd.f32 1.0, %v1652_v59  ;;  %v1403_v59 = vunpack.c.h.bf16 %v1422_v58 }
 0x3b3   :  { %v285_v62 = vadd.f32 1.0, %v1654_v60  ;;  %v1402_v60 = vunpack.c.l.bf16 %v1422_v58 }
 0x3b4   :  { %1655 = vrcp.f32 %v286_v61 }
 0x3b5   :  { %1657 = vrcp.f32 %v285_v62 }
 0x3be   :  { %v1656_v63 = vpop.eup %1655 }
 0x3bf   :  { %v1658_v1 = vpop.eup %1657  ;;  %v294_v7 = vmul.f32 %v1656_v63, %v159_v39 }
 0x3c0   :  { %v293_v9 = vmul.f32 %v1658_v1, %v158_v36 }
 0x422   :  { %v300_v0 = vpop.permute.xlu1 %299 }
 0x423   :  { %v304_v2 = vmul.f32 %v1656_v63, %v300_v0  ;;  %v298_v3 = vpop.permute.xlu0 %297 }
 0x424   :  { %v303_v5 = vmul.f32 %v1658_v1, %v298_v3 }
 0x425   :  { %309 = vrot.lane.b32.xlu1 %v304_v2, %s1760_s1 }
 0x426   :  { %307 = vrot.lane.b32.xlu0 %v303_v5, %s1760_s1 }
 0x497   :  { %v310_v8 = vpop.permute.xlu1 %309 }
 0x498   :  { %v314_v10 = vadd.f32 %v310_v8, %v294_v7  ;;  %v308_v11 = vpop.permute.xlu0 %307 }
 0x499   :  { %v313_v12 = vadd.f32 %v308_v11, %v293_v9 }
 0x49a   :  { %1659 = vtanh.f32 %v314_v10 }
 0x49b   :  { %1661 = vtanh.f32 %v313_v12 }
 0x4a4   :  { %v1660_v13 = vpop.eup %1659 }
 0x4a5   :  { %v1662_v14 = vpop.eup %1661  ;;  %321 = vrot.lane.b32.xlu1 %v1660_v13, %s1761_s19 }
 0x4a6   :  { %319 = vrot.lane.b32.xlu0 %v1662_v14, %s1761_s19 }
 0x517   :  { %v322_v15 = vpop.permute.xlu1 %321 }
 0x518   :  { %v1848_v16 = vmul.f32 %v1656_v63, %v322_v15  ;;  %v320_v17 = vpop.permute.xlu0 %319 }
 0x519   :  { %v1850_v18 = vmul.f32 %v1658_v1, %v320_v17 }
 0x51a   :  { %351 = vrot.lane.b32.xlu1 %v1848_v16, %s1760_s1 }
 0x51b   :  { %349 = vrot.lane.b32.xlu0 %v1850_v18, %s1760_s1 }
 0x58c   :  { %v352_v20 = vpop.permute.xlu1 %351 }
 0x58d   :  { %v350_v19 = vpop.permute.xlu0 %349 }
 0x58e   :  { %1505 = vmatprep.mubr.msk.f32.mxu0 %vm15_vm0, %v350_v19 }
 0x58f   :  { %1506 = vmatmul.mubr.msk.f32.vlgmr.msra.gmra.mrb[2].mxu0 %vm15_vm0, %v352_v20 }
 0x590   :  { %1598 = vmatpush3.bf16.msra.mxu0 %v1791_v4 }
 0x591   :  { %1600 = vmatprep.subr.bf16.mxu0 %v1796_v6 }
 0x594   :  { %1602 = vmatpush3.bf16.msra.mxu0 %v1796_v6 }
 0x595   :  { %1612 = vmatprep.subr.bf16.mxu0 %v1791_v4 }
 0x662   :  { %v1507_v24 = vpop.f32.mrb[2].mxu0 }
 0x663   :  { %v433_v25 = vadd.f32 %v1507_v24, %v1399_v22  ;;  %v423_v26 = vpop.f32.mrb[3].mxu0 }
 0x664   :  { %v432_v27 = vadd.f32 %v1398_v23, %v423_v26 }
 0x665   :  { %1663 = vtanh.f32 %v433_v25  ;;  %v1317_v30 = vmul.f32 -1.442695, %v433_v25 }
 0x666   :  { %1665 = vtanh.f32 %v432_v27  ;;  %v1316_v31 = vmul.f32 -1.442695, %v432_v27 }
 0x667   :  { %1667 = vpow2.f32 %v1317_v30 }
 0x668   :  { %1669 = vpow2.f32 %v1316_v31 }
 0x66f   :  { %v1664_v28 = vpop.eup %1663 }
 0x670   :  { %v1666_v29 = vpop.eup %1665  ;;  %454 = vrot.lane.b32.xlu1 %v1664_v28, %s1761_s19 }
 0x671   :  { %452 = vrot.lane.b32.xlu0 %v1666_v29, %s1761_s19  ;;  %v1668_v32 = vpop.eup %1667 }
 0x672   :  { %v1670_v33 = vpop.eup %1669  ;;  %v441_v34 = vadd.f32 1.0, %v1668_v32 }
 0x673   :  { %v440_v35 = vadd.f32 1.0, %v1670_v33  ;;  %v1423_v33 = vld [vmem:[%s2091_s0 + $0x20] sm:$0xff]  }
 0x674   :  { %1671 = vrcp.f32 %v441_v34  ;;  %v1407_v34 = vunpack.c.h.bf16 %v1423_v33 }
 0x675   :  { %1673 = vrcp.f32 %v440_v35  ;;  %v1406_v35 = vunpack.c.l.bf16 %v1423_v33 }
 0x67e   :  { %v1672_v36 = vpop.eup %1671 }
 0x67f   :  { %v1674_v38 = vpop.eup %1673  ;;  %v449_v42 = vmul.f32 %v1672_v36, %v314_v10 }
 0x680   :  { %v448_v46 = vmul.f32 %v1674_v38, %v313_v12 }
 0x6e2   :  { %v455_v37 = vpop.permute.xlu1 %454 }
 0x6e3   :  { %v459_v39 = vmul.f32 %v1672_v36, %v455_v37  ;;  %v453_v40 = vpop.permute.xlu0 %452 }
 0x6e4   :  { %v458_v41 = vmul.f32 %v1674_v38, %v453_v40 }
 0x6e5   :  { %464 = vrot.lane.b32.xlu1 %v459_v39, %s1760_s1 }
 0x6e6   :  { %462 = vrot.lane.b32.xlu0 %v458_v41, %s1760_s1 }
 0x757   :  { %v465_v44 = vpop.permute.xlu1 %464 }
 0x758   :  { %v469_v47 = vadd.f32 %v465_v44, %v449_v42  ;;  %v463_v48 = vpop.permute.xlu0 %462 }
 0x759   :  { %v468_v49 = vadd.f32 %v463_v48, %v448_v46 }
 0x75a   :  { %1675 = vtanh.f32 %v469_v47 }
 0x75b   :  { %1677 = vtanh.f32 %v468_v49 }
 0x764   :  { %v1676_v50 = vpop.eup %1675 }
 0x765   :  { %v1678_v51 = vpop.eup %1677  ;;  %476 = vrot.lane.b32.xlu1 %v1676_v50, %s1761_s19 }
 0x766   :  { %474 = vrot.lane.b32.xlu0 %v1678_v51, %s1761_s19 }
 0x7d7   :  { %v477_v52 = vpop.permute.xlu1 %476 }
 0x7d8   :  { %v1871_v53 = vmul.f32 %v1672_v36, %v477_v52  ;;  %v475_v54 = vpop.permute.xlu0 %474 }
 0x7d9   :  { %v1873_v55 = vmul.f32 %v1674_v38, %v475_v54 }
 0x7da   :  { %506 = vrot.lane.b32.xlu1 %v1871_v53, %s1760_s1 }
 0x7db   :  { %504 = vrot.lane.b32.xlu0 %v1873_v55, %s1760_s1 }
 0x84c   :  { %v507_v57 = vpop.permute.xlu1 %506 }
 0x84d   :  { %v505_v56 = vpop.permute.xlu0 %504 }
 0x84e   :  { %1516 = vmatprep.mubr.msk.f32.mxu1 %vm15_vm0, %v505_v56 }
 0x84f   :  { %1517 = vmatmul.mubr.msk.f32.vlgmr.msra.gmra.mrb[2].mxu1 %vm15_vm0, %v507_v57 }
 0x850   :  { %1606 = vmatpush3.bf16.msra.mxu1 %v1791_v4 }
 0x851   :  { %1608 = vmatprep.subr.bf16.mxu1 %v1796_v6 }
 0x854   :  { %1610 = vmatpush3.bf16.msra.mxu1 %v1796_v6 }
 0x855   :  { %1620 = vmatprep.subr.bf16.mxu1 %v1791_v4 }
 0x922   :  { %v1518_v61 = vpop.f32.mrb[2].mxu1 }
 0x923   :  { %v588_v62 = vadd.f32 %v1518_v61, %v1403_v59  ;;  %v578_v63 = vpop.f32.mrb[3].mxu1 }
 0x924   :  { %v587_v0 = vadd.f32 %v1402_v60, %v578_v63 }
 0x925   :  { %1679 = vtanh.f32 %v588_v62  ;;  %v1327_v3 = vmul.f32 -1.442695, %v588_v62 }
 0x926   :  { %1681 = vtanh.f32 %v587_v0  ;;  %v1326_v5 = vmul.f32 -1.442695, %v587_v0 }
 0x927   :  { %1683 = vpow2.f32 %v1327_v3 }
 0x928   :  { %1685 = vpow2.f32 %v1326_v5 }
 0x92f   :  { %v1680_v1 = vpop.eup %1679 }
 0x930   :  { %v1682_v2 = vpop.eup %1681  ;;  %609 = vrot.lane.b32.xlu1 %v1680_v1, %s1761_s19 }
 0x931   :  { %607 = vrot.lane.b32.xlu0 %v1682_v2, %s1761_s19  ;;  %v1684_v7 = vpop.eup %1683 }
 0x932   :  { %v1686_v8 = vpop.eup %1685  ;;  %v596_v9 = vadd.f32 1.0, %v1684_v7 }
 0x933   :  { %v595_v10 = vadd.f32 1.0, %v1686_v8 }
 0x934   :  { %1687 = vrcp.f32 %v596_v9 }
 0x935   :  { %1689 = vrcp.f32 %v595_v10  ;;  %v1424_v10 = vld [vmem:[%s2091_s0 + $0x28] sm:$0xff]  }
 0x93e   :  { %v1688_v11 = vpop.eup %1687 }
 0x93f   :  { %v1690_v13 = vpop.eup %1689  ;;  %v604_v19 = vmul.f32 %v1688_v11, %v469_v47 }
 0x940   :  { %v603_v21 = vmul.f32 %v1690_v13, %v468_v49 }
 0x9a2   :  { %v610_v12 = vpop.permute.xlu1 %609 }
 0x9a3   :  { %v614_v14 = vmul.f32 %v1688_v11, %v610_v12  ;;  %v608_v15 = vpop.permute.xlu0 %607  ;;  %v1410_v12 = vunpack.c.l.bf16 %v1424_v10 }
 0x9a4   :  { %v613_v17 = vmul.f32 %v1690_v13, %v608_v15 }
 0x9a5   :  { %619 = vrot.lane.b32.xlu1 %v614_v14, %s1760_s1 }
 0x9a6   :  { %617 = vrot.lane.b32.xlu0 %v613_v17, %s1760_s1 }
 0xa17   :  { %v620_v20 = vpop.permute.xlu1 %619 }
 0xa18   :  { %v624_v22 = vadd.f32 %v620_v20, %v604_v19  ;;  %v618_v23 = vpop.permute.xlu0 %617 }
 0xa19   :  { %v623_v24 = vadd.f32 %v618_v23, %v603_v21 }
 0xa1a   :  { %1691 = vtanh.f32 %v624_v22 }
 0xa1b   :  { %1693 = vtanh.f32 %v623_v24 }
 0xa24   :  { %v1692_v25 = vpop.eup %1691 }
 0xa25   :  { %v1694_v26 = vpop.eup %1693  ;;  %631 = vrot.lane.b32.xlu1 %v1692_v25, %s1761_s19 }
 0xa26   :  { %629 = vrot.lane.b32.xlu0 %v1694_v26, %s1761_s19 }
 0xa97   :  { %v632_v27 = vpop.permute.xlu1 %631 }
 0xa98   :  { %v1894_v28 = vmul.f32 %v1688_v11, %v632_v27  ;;  %v630_v29 = vpop.permute.xlu0 %629  ;;  %v1411_v11 = vunpack.c.h.bf16 %v1424_v10 }
 0xa99   :  { %v1896_v30 = vmul.f32 %v1690_v13, %v630_v29 }
 0xa9a   :  { %661 = vrot.lane.b32.xlu1 %v1894_v28, %s1760_s1 }
 0xa9b   :  { %659 = vrot.lane.b32.xlu0 %v1896_v30, %s1760_s1 }
 0xb0c   :  { %v662_v32 = vpop.permute.xlu1 %661 }
 0xb0d   :  { %v660_v31 = vpop.permute.xlu0 %659 }
 0xb0e   :  { %1527 = vmatprep.mubr.msk.f32.mxu0 %vm15_vm0, %v660_v31 }
 0xb0f   :  { %1528 = vmatmul.mubr.msk.f32.vlgmr.msra.gmra.mrb[4].mxu0 %vm15_vm0, %v662_v32 }
 0xb10   :  { %1614 = vmatpush3.bf16.msra.mxu0 %v1791_v4 }
 0xb11   :  { %1616 = vmatprep.subr.bf16.mxu0 %v1796_v6 }
 0xb14   :  { %1618 = vmatpush3.bf16.msra.mxu0 %v1796_v6 }
 0xbe2   :  { %v1529_v36 = vpop.f32.mrb[4].mxu0 }
 0xbe3   :  { %v743_v37 = vadd.f32 %v1529_v36, %v1407_v34  ;;  %v733_v38 = vpop.f32.mrb[5].mxu0 }
 0xbe4   :  { %v742_v39 = vadd.f32 %v1406_v35, %v733_v38 }
 0xbe5   :  { %1695 = vtanh.f32 %v743_v37  ;;  %v1337_v42 = vmul.f32 -1.442695, %v743_v37 }
 0xbe6   :  { %1697 = vtanh.f32 %v742_v39  ;;  %v1336_v44 = vmul.f32 -1.442695, %v742_v39 }
 0xbe7   :  { %1699 = vpow2.f32 %v1337_v42 }
 0xbe8   :  { %1701 = vpow2.f32 %v1336_v44 }
 0xbef   :  { %v1696_v40 = vpop.eup %1695 }
 0xbf0   :  { %v1698_v41 = vpop.eup %1697  ;;  %764 = vrot.lane.b32.xlu1 %v1696_v40, %s1761_s19 }
 0xbf1   :  { %762 = vrot.lane.b32.xlu0 %v1698_v41, %s1761_s19  ;;  %v1700_v46 = vpop.eup %1699 }
 0xbf2   :  { %v1702_v47 = vpop.eup %1701  ;;  %v751_v48 = vadd.f32 1.0, %v1700_v46 }
 0xbf3   :  { %v750_v49 = vadd.f32 1.0, %v1702_v47 }
 0xbf4   :  { %1703 = vrcp.f32 %v751_v48 }
 0xbf5   :  { %1705 = vrcp.f32 %v750_v49  ;;  %v1425_v49 = vld [vmem:[%s2091_s0 + $0x30] sm:$0xff]  }
 0xbfe   :  { %v1704_v50 = vpop.eup %1703 }
 0xbff   :  { %v1706_v52 = vpop.eup %1705  ;;  %v759_v58 = vmul.f32 %v1704_v50, %v624_v22 }
 0xc00   :  { %v758_v60 = vmul.f32 %v1706_v52, %v623_v24 }
 0xc62   :  { %v765_v51 = vpop.permute.xlu1 %764 }
 0xc63   :  { %v769_v54 = vmul.f32 %v1704_v50, %v765_v51  ;;  %v763_v56 = vpop.permute.xlu0 %762  ;;  %v1414_v51 = vunpack.c.l.bf16 %v1425_v49 }
 0xc64   :  { %v768_v57 = vmul.f32 %v1706_v52, %v763_v56 }
 0xc65   :  { %774 = vrot.lane.b32.xlu1 %v769_v54, %s1760_s1 }
 0xc66   :  { %772 = vrot.lane.b32.xlu0 %v768_v57, %s1760_s1 }
 0xcd7   :  { %v775_v59 = vpop.permute.xlu1 %774 }
 0xcd8   :  { %v779_v61 = vadd.f32 %v775_v59, %v759_v58  ;;  %v773_v62 = vpop.permute.xlu0 %772 }
 0xcd9   :  { %v778_v63 = vadd.f32 %v773_v62, %v758_v60 }
 0xcda   :  { %1707 = vtanh.f32 %v779_v61 }
 0xcdb   :  { %1709 = vtanh.f32 %v778_v63 }
 0xce4   :  { %v1708_v0 = vpop.eup %1707 }
 0xce5   :  { %v1710_v1 = vpop.eup %1709  ;;  %786 = vrot.lane.b32.xlu1 %v1708_v0, %s1761_s19 }
 0xce6   :  { %784 = vrot.lane.b32.xlu0 %v1710_v1, %s1761_s19 }
 0xd57   :  { %v787_v2 = vpop.permute.xlu1 %786 }
 0xd58   :  { %v1916_v3 = vmul.f32 %v1704_v50, %v787_v2  ;;  %v785_v5 = vpop.permute.xlu0 %784  ;;  %v1415_v50 = vunpack.c.h.bf16 %v1425_v49 }
 0xd59   :  { %v1918_v7 = vmul.f32 %v1706_v52, %v785_v5 }
 0xd5a   :  { %816 = vrot.lane.b32.xlu1 %v1916_v3, %s1760_s1 }
 0xd5b   :  { %814 = vrot.lane.b32.xlu0 %v1918_v7, %s1760_s1 }
 0xdcc   :  { %v817_v9 = vpop.permute.xlu1 %816 }
 0xdcd   :  { %v815_v8 = vpop.permute.xlu0 %814 }
 0xdce   :  { %1538 = vmatprep.mubr.msk.f32.mxu1 %vm15_vm0, %v815_v8 }
 0xdcf   :  { %1539 = vmatmul.mubr.msk.f32.vlgmr.msra.gmra.mrb[4].mxu1 %vm15_vm0, %v817_v9 }
 0xdd0   :  { %1622 = vmatpush3.bf16.msra.mxu1 %v1791_v4 }
 0xdd1   :  { %1624 = vmatprep.subr.bf16.mxu1 %v1796_v6 }
 0xdd4   :  { %1626 = vmatpush3.bf16.msra.mxu1 %v1796_v6 }
 0xea2   :  { %v1540_v13 = vpop.f32.mrb[4].mxu1 }
 0xea3   :  { %v898_v14 = vadd.f32 %v1540_v13, %v1411_v11  ;;  %v888_v15 = vpop.f32.mrb[5].mxu1 }
 0xea4   :  { %v897_v17 = vadd.f32 %v1410_v12, %v888_v15 }
 0xea5   :  { %1711 = vtanh.f32 %v898_v14  ;;  %v1347_v4 = vmul.f32 -1.442695, %v898_v14 }
 0xea6   :  { %1713 = vtanh.f32 %v897_v17  ;;  %v1346_v6 = vmul.f32 -1.442695, %v897_v17 }
 0xea7   :  { %1715 = vpow2.f32 %v1347_v4 }
 0xea8   :  { %1717 = vpow2.f32 %v1346_v6 }
 0xeaf   :  { %v1712_v19 = vpop.eup %1711 }
 0xeb0   :  { %v1714_v20 = vpop.eup %1713  ;;  %919 = vrot.lane.b32.xlu1 %v1712_v19, %s1761_s19 }
 0xeb1   :  { %917 = vrot.lane.b32.xlu0 %v1714_v20, %s1761_s19  ;;  %v1716_v21 = vpop.eup %1715 }
 0xeb2   :  { %v1718_v22 = vpop.eup %1717  ;;  %v906_v23 = vadd.f32 1.0, %v1716_v21 }
 0xeb3   :  { %v905_v24 = vadd.f32 1.0, %v1718_v22 }
 0xeb4   :  { %1719 = vrcp.f32 %v906_v23 }
 0xeb5   :  { %1721 = vrcp.f32 %v905_v24 }
 0xebe   :  { %v1720_v25 = vpop.eup %1719 }
 0xebf   :  { %v1722_v27 = vpop.eup %1721  ;;  %v914_v33 = vmul.f32 %v1720_v25, %v779_v61 }
 0xec0   :  { %v913_v35 = vmul.f32 %v1722_v27, %v778_v63 }
 0xf22   :  { %v920_v26 = vpop.permute.xlu1 %919 }
 0xf23   :  { %v924_v29 = vmul.f32 %v1720_v25, %v920_v26  ;;  %v918_v31 = vpop.permute.xlu0 %917  ;;  %v1426_v26 = vld [vmem:[%s2091_s0 + $0x38] sm:$0xff]  }
 0xf24   :  { %v923_v32 = vmul.f32 %v1722_v27, %v918_v31 }
 0xf25   :  { %929 = vrot.lane.b32.xlu1 %v924_v29, %s1760_s1  ;;  %v1418_v29 = vunpack.c.l.bf16 %v1426_v26 }
 0xf26   :  { %927 = vrot.lane.b32.xlu0 %v923_v32, %s1760_s1 }
 0xf97   :  { %v930_v34 = vpop.permute.xlu1 %929 }
 0xf98   :  { %v934_v36 = vadd.f32 %v930_v34, %v914_v33  ;;  %v928_v37 = vpop.permute.xlu0 %927 }
 0xf99   :  { %v933_v38 = vadd.f32 %v928_v37, %v913_v35 }
 0xf9a   :  { %1723 = vtanh.f32 %v934_v36 }
 0xf9b   :  { %1725 = vtanh.f32 %v933_v38 }
 0xfa4   :  { %v1724_v39 = vpop.eup %1723 }
 0xfa5   :  { %v1726_v40 = vpop.eup %1725  ;;  %941 = vrot.lane.b32.xlu1 %v1724_v39, %s1761_s19 }
 0xfa6   :  { %939 = vrot.lane.b32.xlu0 %v1726_v40, %s1761_s19 }
0x1017   :  { %v942_v41 = vpop.permute.xlu1 %941 }
0x1018   :  { %v1938_v42 = vmul.f32 %v1720_v25, %v942_v41  ;;  %v940_v44 = vpop.permute.xlu0 %939 }
0x1019   :  { %v1940_v46 = vmul.f32 %v1722_v27, %v940_v44  ;;  %v1419_v27 = vunpack.c.h.bf16 %v1426_v26 }
0x101a   :  { %971 = vrot.lane.b32.xlu1 %v1938_v42, %s1760_s1 }
0x101b   :  { %969 = vrot.lane.b32.xlu0 %v1940_v46, %s1760_s1 }
0x108c   :  { %v972_v48 = vpop.permute.xlu1 %971 }
0x108d   :  { %v970_v47 = vpop.permute.xlu0 %969 }
0x108e   :  { %1549 = vmatprep.mubr.msk.f32.mxu0 %vm15_vm0, %v970_v47 }
0x108f   :  { %1550 = vmatmul.mubr.msk.f32.vlgmr.msra.gmra.mrb[6].mxu0 %vm15_vm0, %v972_v48 }
0x1162   :  { %v1551_v52 = vpop.f32.mrb[6].mxu0 }
0x1163   :  { %v1053_v54 = vadd.f32 %v1551_v52, %v1415_v50  ;;  %v1043_v56 = vpop.f32.mrb[7].mxu0 }
0x1164   :  { %v1052_v57 = vadd.f32 %v1414_v51, %v1043_v56 }
0x1165   :  { %1727 = vtanh.f32 %v1053_v54  ;;  %v1357_v60 = vmul.f32 -1.442695, %v1053_v54 }
0x1166   :  { %1729 = vtanh.f32 %v1052_v57  ;;  %v1356_v61 = vmul.f32 -1.442695, %v1052_v57 }
0x1167   :  { %1731 = vpow2.f32 %v1357_v60 }
0x1168   :  { %1733 = vpow2.f32 %v1356_v61 }
0x116f   :  { %v1728_v58 = vpop.eup %1727 }
0x1170   :  { %v1730_v59 = vpop.eup %1729  ;;  %1074 = vrot.lane.b32.xlu1 %v1728_v58, %s1761_s19 }
0x1171   :  { %1072 = vrot.lane.b32.xlu0 %v1730_v59, %s1761_s19  ;;  %v1732_v62 = vpop.eup %1731 }
0x1172   :  { %v1734_v63 = vpop.eup %1733  ;;  %v1061_v0 = vadd.f32 1.0, %v1732_v62 }
0x1173   :  { %v1060_v1 = vadd.f32 1.0, %v1734_v63  ;;  %v1373_v63 = vpack.c.bf16 %v1829_v45, %v1829_v45  ;;  %v1377_v45 = vpack.c.bf16 %v1871_v53, %v1871_v53  ;;  %v1381_v53 = vpack.c.bf16 %v1916_v3, %v1916_v3 }
0x1174   :  { %1735 = vrcp.f32 %v1061_v0  ;;  %v1372_v0 = vpack.c.bf16 %v1825_v43, %v1825_v43  ;;  %v1376_v43 = vpack.c.bf16 %v1873_v55, %v1873_v55  ;;  %v1380_v55 = vpack.c.bf16 %v1918_v7, %v1918_v7 }
0x1175   :  { %1737 = vrcp.f32 %v1060_v1  ;;  %v1375_v1 = vpack.c.bf16 %v1848_v16, %v1848_v16  ;;  %v1379_v16 = vpack.c.bf16 %v1894_v28, %v1894_v28  ;;  %v1383_v28 = vpack.c.bf16 %v1938_v42, %v1938_v42 }
0x117e   :  { %v1736_v2 = vpop.eup %1735 }
0x117f   :  { %v1738_v8 = vpop.eup %1737  ;;  %v1069_v12 = vmul.f32 %v1736_v2, %v934_v36 }
0x1180   :  { %v1068_v14 = vmul.f32 %v1738_v8, %v933_v38 }
0x11e2   :  { %v1075_v5 = vpop.permute.xlu1 %1074 }
0x11e3   :  { %v1079_v9 = vmul.f32 %v1736_v2, %v1075_v5  ;;  %v1073_v10 = vpop.permute.xlu0 %1072 }
0x11e4   :  { %v1078_v11 = vmul.f32 %v1738_v8, %v1073_v10 }
0x11e5   :  { %1084 = vrot.lane.b32.xlu1 %v1079_v9, %s1760_s1 }
0x11e6   :  { %1082 = vrot.lane.b32.xlu0 %v1078_v11, %s1760_s1 }
0x1257   :  { %v1085_v13 = vpop.permute.xlu1 %1084 }
0x1258   :  { %v1089_v15 = vadd.f32 %v1085_v13, %v1069_v12  ;;  %v1083_v17 = vpop.permute.xlu0 %1082 }
0x1259   :  { %v1088_v19 = vadd.f32 %v1083_v17, %v1068_v14 }
0x125a   :  { %1739 = vtanh.f32 %v1089_v15 }
0x125b   :  { %1741 = vtanh.f32 %v1088_v19 }
0x1264   :  { %v1740_v20 = vpop.eup %1739 }
0x1265   :  { %v1742_v4 = vpop.eup %1741  ;;  %1096 = vrot.lane.b32.xlu1 %v1740_v20, %s1761_s19 }
0x1266   :  { %1094 = vrot.lane.b32.xlu0 %v1742_v4, %s1761_s19 }
0x12d7   :  { %v1097_v6 = vpop.permute.xlu1 %1096 }
0x12d8   :  { %v1957_v21 = vmul.f32 %v1736_v2, %v1097_v6  ;;  %v1095_v22 = vpop.permute.xlu0 %1094  ;;  %v1374_v2 = vpack.c.bf16 %v1850_v18, %v1850_v18  ;;  %v1378_v18 = vpack.c.bf16 %v1896_v30, %v1896_v30  ;;  %v1382_v30 = vpack.c.bf16 %v1940_v46, %v1940_v46 }
0x12d9   :  { %v1959_v23 = vmul.f32 %v1738_v8, %v1095_v22 }
0x12da   :  { %1126 = vrot.lane.b32.xlu1 %v1957_v21, %s1760_s1  ;;  %v1385_v3 = vpack.c.bf16 %v1957_v21, %v1957_v21 }
0x12db   :  { %1124 = vrot.lane.b32.xlu0 %v1959_v23, %s1760_s1  ;;  %v1384_v7 = vpack.c.bf16 %v1959_v23, %v1959_v23 }
0x134c   :  { %v1127_v25 = vpop.permute.xlu1 %1126 }
0x134d   :  { %v1125_v24 = vpop.permute.xlu0 %1124 }
0x134e   :  { %1560 = vmatprep.mubr.msk.f32.mxu1 %vm15_vm0, %v1125_v24 }
0x134f   :  { %1561 = vmatmul.mubr.msk.f32.vlgmr.msra.gmra.mrb[6].mxu1 %vm15_vm0, %v1127_v25 }
0x1422   :  { %v1562_v31 = vpop.f32.mrb[6].mxu1 }
0x1423   :  { %v1208_v32 = vadd.f32 %v1562_v31, %v1419_v27  ;;  %v1198_v33 = vpop.f32.mrb[7].mxu1 }
0x1424   :  { %v1207_v34 = vadd.f32 %v1418_v29, %v1198_v33 }
0x1425   :  { %1743 = vtanh.f32 %v1208_v32  ;;  %v1367_v37 = vmul.f32 -1.442695, %v1208_v32 }
0x1426   :  { %1745 = vtanh.f32 %v1207_v34  ;;  %v1366_v38 = vmul.f32 -1.442695, %v1207_v34 }
0x1427   :  { %1747 = vpow2.f32 %v1367_v37 }
0x1428   :  { %1749 = vpow2.f32 %v1366_v38 }
0x142f   :  { %v1744_v35 = vpop.eup %1743 }
0x1430   :  { %v1746_v36 = vpop.eup %1745  ;;  %1229 = vrot.lane.b32.xlu1 %v1744_v35, %s1761_s19 }
0x1431   :  { %1227 = vrot.lane.b32.xlu0 %v1746_v36, %s1761_s19  ;;  %v1748_v39 = vpop.eup %1747 }
0x1432   :  { %v1750_v40 = vpop.eup %1749  ;;  %v1216_v41 = vadd.f32 1.0, %v1748_v39 }
0x1433   :  { %v1215_v44 = vadd.f32 1.0, %v1750_v40 }
0x1434   :  { %1751 = vrcp.f32 %v1216_v41 }
0x1435   :  { %1753 = vrcp.f32 %v1215_v44 }
0x143e   :  { %v1752_v47 = vpop.eup %1751 }
0x143f   :  { %v1754_v49 = vpop.eup %1753  ;;  %v1224_v54 = vmul.f32 %v1752_v47, %v1089_v15 }
0x1440   :  { %v1223_v57 = vmul.f32 %v1754_v49, %v1088_v19 }
0x14a2   :  { %v1230_v48 = vpop.permute.xlu1 %1229 }
0x14a3   :  { %v1234_v50 = vmul.f32 %v1752_v47, %v1230_v48  ;;  %v1228_v51 = vpop.permute.xlu0 %1227 }
0x14a4   :  { %v1233_v52 = vmul.f32 %v1754_v49, %v1228_v51 }
0x14a5   :  { %1239 = vrot.lane.b32.xlu1 %v1234_v50, %s1760_s1 }
0x14a6   :  { %1237 = vrot.lane.b32.xlu0 %v1233_v52, %s1760_s1 }
0x1517   :  { %v1240_v56 = vpop.permute.xlu1 %1239 }
0x1518   :  { %v1244_v58 = vadd.f32 %v1240_v56, %v1224_v54  ;;  %v1238_v59 = vpop.permute.xlu0 %1237 }
0x1519   :  { %v1243_v60 = vadd.f32 %v1238_v59, %v1223_v57 }
0x151a   :  { %1755 = vtanh.f32 %v1244_v58 }
0x151b   :  { %1757 = vtanh.f32 %v1243_v60 }
0x1524   :  { %v1756_v61 = vpop.eup %1755 }
0x1525   :  { %v1758_v62 = vpop.eup %1757  ;;  %1251 = vrot.lane.b32.xlu1 %v1756_v61, %s1761_s19 }
0x1526   :  { %1249 = vrot.lane.b32.xlu0 %v1758_v62, %s1761_s19 }
0x1529   :  { %180 = vrot.lane.b32.xlu1 %v1373_v63, %s1760_s1 }
0x152a   :  { %178 = vrot.lane.b32.xlu0 %v1372_v0, %s1760_s1 }
0x152d   :  { %335 = vrot.lane.b32.xlu1 %v1375_v1, %s1760_s1 }
0x152e   :  { %333 = vrot.lane.b32.xlu0 %v1374_v2, %s1760_s1 }
0x1531   :  { %490 = vrot.lane.b32.xlu1 %v1377_v45, %s1760_s1 }
0x1532   :  { %488 = vrot.lane.b32.xlu0 %v1376_v43, %s1760_s1 }
0x1535   :  { %645 = vrot.lane.b32.xlu1 %v1379_v16, %s1760_s1 }
0x1536   :  { %643 = vrot.lane.b32.xlu0 %v1378_v18, %s1760_s1 }
0x1539   :  { %800 = vrot.lane.b32.xlu1 %v1381_v53, %s1760_s1 }
0x153a   :  { %798 = vrot.lane.b32.xlu0 %v1380_v55, %s1760_s1 }
0x153d   :  { %955 = vrot.lane.b32.xlu1 %v1383_v28, %s1760_s1 }
0x153e   :  { %953 = vrot.lane.b32.xlu0 %v1382_v30, %s1760_s1 }
0x1541   :  { %1110 = vrot.lane.b32.xlu1 %v1385_v3, %s1760_s1 }
0x1542   :  { %1108 = vrot.lane.b32.xlu0 %v1384_v7, %s1760_s1 }
0x1597   :  { %v1252_v5 = vpop.permute.xlu1 %1251 }
0x1598   :  { %v1256_v8 = vmul.f32 %v1752_v47, %v1252_v5  ;;  %v1250_v42 = vpop.permute.xlu0 %1249 }
0x1599   :  { %v1255_v9 = vmul.f32 %v1754_v49, %v1250_v42 }
0x159a   :  { %1276 = vrot.lane.b32.xlu1 %v1256_v8, %s1760_s1  ;;  %v1387_v10 = vpack.c.bf16 %v1256_v8, %v1256_v8 }
0x159b   :  { %v181_v46 = vpop.permute.xlu1 %180  ;;  %1274 = vrot.lane.b32.xlu0 %v1255_v9, %s1760_s1  ;;  %v1386_v12 = vpack.c.bf16 %v1255_v9, %v1255_v9 }
0x159c   :  { %186 = vst.msk [vmem:[%s2092_s2 + $0x4] sm:$0xf] %vm184_vm1, %v181_v46  ;;  %v179_v11 = vpop.permute.xlu0 %178 }
0x159d   :  { %185 = vst.msk [vmem:[%s2092_s2] sm:$0xf] %vm184_vm1, %v179_v11 }
0x159e   :  { %1265 = vrot.lane.b32.xlu1 %v1387_v10, %s1760_s1 }
0x159f   :  { %v336_v13 = vpop.permute.xlu1 %335  ;;  %1263 = vrot.lane.b32.xlu0 %v1386_v12, %s1760_s1 }
0x15a0   :  { %1311 = vst.msk [vmem:[%s2092_s2 + $0xc] sm:$0xf] %vm184_vm1, %v336_v13  ;;  %v334_v14 = vpop.permute.xlu0 %333 }
0x15a1   :  { %1310 = vst.msk [vmem:[%s2092_s2 + $0x8] sm:$0xf] %vm184_vm1, %v334_v14 }
0x15a2   :  { %1286 = vrot.lane.b32.xlu1 %v1244_v58, %s1762_s13 }
0x15a3   :  { %v491_v15 = vpop.permute.xlu1 %490  ;;  %1284 = vrot.lane.b32.xlu0 %v1243_v60, %s1762_s13 }
0x15a4   :  { %1321 = vst.msk [vmem:[%s2092_s2 + $0x14] sm:$0xf] %vm184_vm1, %v491_v15  ;;  %v489_v17 = vpop.permute.xlu0 %488 }
0x15a5   :  { %1320 = vst.msk [vmem:[%s2092_s2 + $0x10] sm:$0xf] %vm184_vm1, %v489_v17 }
0x15a7   :  { %v646_v19 = vpop.permute.xlu1 %645 }
0x15a8   :  { %1331 = vst.msk [vmem:[%s2092_s2 + $0x1c] sm:$0xf] %vm184_vm1, %v646_v19  ;;  %v644_v20 = vpop.permute.xlu0 %643 }
0x15a9   :  { %1330 = vst.msk [vmem:[%s2092_s2 + $0x18] sm:$0xf] %vm184_vm1, %v644_v20 }
0x15ab   :  { %v801_v4 = vpop.permute.xlu1 %800 }
0x15ac   :  { %1341 = vst.msk [vmem:[%s2092_s2 + $0x24] sm:$0xf] %vm184_vm1, %v801_v4  ;;  %v799_v6 = vpop.permute.xlu0 %798 }
0x15ad   :  { %1340 = vst.msk [vmem:[%s2092_s2 + $0x20] sm:$0xf] %vm184_vm1, %v799_v6 }
0x15af   :  { %v956_v21 = vpop.permute.xlu1 %955 }
0x15b0   :  { %1351 = vst.msk [vmem:[%s2092_s2 + $0x2c] sm:$0xf] %vm184_vm1, %v956_v21  ;;  %v954_v22 = vpop.permute.xlu0 %953 }
0x15b1   :  { %1350 = vst.msk [vmem:[%s2092_s2 + $0x28] sm:$0xf] %vm184_vm1, %v954_v22 }
0x15b3   :  { %v1111_v23 = vpop.permute.xlu1 %1110 }
0x15b4   :  { %1361 = vst.msk [vmem:[%s2092_s2 + $0x34] sm:$0xf] %vm184_vm1, %v1111_v23  ;;  %v1109_v24 = vpop.permute.xlu0 %1108 }
0x15b5   :  { %1360 = vst.msk [vmem:[%s2092_s2 + $0x30] sm:$0xf] %vm184_vm1, %v1109_v24 }
0x160c   :  { %v1277_v25 = vpop.permute.xlu1 %1276 }
0x160d   :  { %1281 = vst.msk [vmem:[#allocation2 + $0x8] sm:$0xff] %vm15_vm0, %v1277_v25  ;;  %v1275_v26 = vpop.permute.xlu0 %1274 }
0x160e   :  { %1280 = vst.msk [vmem:[#allocation2] sm:$0xff] %vm15_vm0, %v1275_v26 }
0x1610   :  { %v1266_v27 = vpop.permute.xlu1 %1265 }
0x1611   :  { %1371 = vst.msk [vmem:[%s2092_s2 + $0x3c] sm:$0xf] %vm184_vm1, %v1266_v27  ;;  %v1264_v29 = vpop.permute.xlu0 %1263 }
0x1612   :  { %1370 = vst.msk [vmem:[%s2092_s2 + $0x38] sm:$0xf] %vm184_vm1, %v1264_v29 }
0x1614   :  { %v1287_v31 = vpop.permute.xlu1 %1286 }
0x1615   :  { %1291 = vst.msk [vmem:[#allocation3 + $0x8] sm:$0xff] %vm15_vm0, %v1287_v31  ;;  %v1285_v32 = vpop.permute.xlu0 %1284 }
0x1616   :  { %1290 = vst.msk [vmem:[#allocation3] sm:$0xff] %vm15_vm0, %v1285_v32 }

</bundles_post_ra>
